<compile_context>
chip_gen: v6e
topology: v6e:2x2x1
jax: 0.10.0
libtpu: 0.0.40
codegen_flags: <defaults>
</compile_context>

<pallas_src>
import math

import jax
import jax.numpy as jnp
from jax import lax
from jax.experimental import pallas as pl
from jax.experimental.pallas import tpu as pltpu


# ----------------------------------------------------------------------------
# Kernel: fused fc1 -> GELU(exact erf) -> fc2 on one row tile
# ----------------------------------------------------------------------------
def mlp_kernel(x_ref, w1_ref, b1_ref, w2_ref, b2_ref, o_ref):
    # x_ref:  (TILE_M, C_in)   one tile of tokens
    # w1_ref: (C_in, hidden)   bf16, VMEM-resident
    # w2_ref: (hidden, C_out)  bf16, VMEM-resident
    # b1/b2:  (1, hidden)/(1, C_out) f32
    x = x_ref[...].astype(jnp.bfloat16)                       # bf16 at MXU input
    h = jnp.dot(x, w1_ref[...], preferred_element_type=jnp.float32)
    h = h + b1_ref[...].astype(jnp.float32)
    # exact (erf) GELU, matches nn.GELU() default; f32 elementwise
    h = 0.5 * h * (1.0 + lax.erf(h * (1.0 / math.sqrt(2.0))))
    o = jnp.dot(h.astype(jnp.bfloat16), w2_ref[...],
                preferred_element_type=jnp.float32)
    o = o + b2_ref[...].astype(jnp.float32)
    # Dropout layers are identity (drop=0.0 / eval mode).
    o_ref[...] = o.astype(o_ref.dtype)


# ----------------------------------------------------------------------------
# Wrapper
# ----------------------------------------------------------------------------
def _pick_tile_m(m_rows, c_in, hidden, c_out, budget_bytes=24 << 20):
    """Largest power-of-two row tile (<=1024, >=8) whose f32 live activations
    (double-buffered x/out tiles + hidden intermediate) fit the VMEM budget
    — conservative enough for v7x's 64 MiB VMEM."""
    per_row_bytes = (2 * c_in + hidden + 2 * c_out) * 4
    t = 1024
    while t > 8 and t * per_row_bytes > budget_bytes:
        t //= 2
    m_rounded = max(8, ((m_rows + 7) // 8) * 8)
    return max(8, min(t, m_rounded))


def pallas_mlp(x, w1, b1, w2, b2, *, tile_m=None, interpret=False):
    """x: (..., C_in) f32; w1: (C_in, hidden) bf16; w2: (hidden, C_out) bf16."""
    c_in, hidden = w1.shape
    c_out = w2.shape[1]
    assert x.shape[-1] == c_in

    lead_shape = x.shape[:-1]
    x2 = x.reshape(-1, c_in)
    m_rows = x2.shape[0]

    if tile_m is None:
        tile_m = _pick_tile_m(m_rows, c_in, hidden, c_out)
    m_pad = ((m_rows + tile_m - 1) // tile_m) * tile_m
    if m_pad != m_rows:
        x2 = jnp.pad(x2, ((0, m_pad - m_rows), (0, 0)))

    grid = (m_pad // tile_m,)

    # VMEM accounting: resident weights + double-buffered activation tiles.
    weight_bytes = (w1.size + w2.size) * w1.dtype.itemsize + (b1.size + b2.size) * 4
    act_bytes = tile_m * (2 * c_in + hidden + 2 * c_out) * 4
    vmem_limit = int(min(max(2 * (weight_bytes + act_bytes), 4 << 20), 48 << 20))

    out = pl.pallas_call(
        mlp_kernel,
        out_shape=jax.ShapeDtypeStruct((m_pad, c_out), x.dtype),
        grid=grid,
        in_specs=[
            pl.BlockSpec((tile_m, c_in), lambda i: (i, 0)),     # streamed rows
            pl.BlockSpec((c_in, hidden), lambda i: (0, 0)),     # resident weight
            pl.BlockSpec((1, hidden), lambda i: (0, 0)),        # resident bias
            pl.BlockSpec((hidden, c_out), lambda i: (0, 0)),    # resident weight
            pl.BlockSpec((1, c_out), lambda i: (0, 0)),         # resident bias
        ],
        out_specs=pl.BlockSpec((tile_m, c_out), lambda i: (i, 0)),
        compiler_params=pltpu.CompilerParams(
            dimension_semantics=("parallel",),   # shards row tiles across v7x TCs
            vmem_limit_bytes=vmem_limit,
        ),
        interpret=interpret,
    )(x2, w1, b1.reshape(1, -1), w2, b2.reshape(1, -1))

    if m_pad != m_rows:
        out = out[:m_rows]
    return out.reshape(*lead_shape, c_out)


# ----------------------------------------------------------------------------
# Main
# ----------------------------------------------------------------------------
if __name__ == "__main__":
    key = jax.random.PRNGKey(0)
    kx, k1, k2, k3, k4 = jax.random.split(key, 5)

    # Small ViT-like shapes: (B, L, C) tokens, mlp_ratio = 4.
    B, L, C = 2, 512, 128
    hidden = 4 * C  # 512

    x = jax.random.normal(kx, (B, L, C), jnp.float32)
    # Weights stored transposed for x @ W + b; kept in bf16 (MXU fast path,
    # half the weight DMA / VMEM residency).
    w1 = (jax.random.normal(k1, (C, hidden), jnp.float32) * 0.02).astype(jnp.bfloat16)
    b1 = jax.random.normal(k2, (hidden,), jnp.float32) * 0.02
    w2 = (jax.random.normal(k3, (hidden, C), jnp.float32) * 0.02).astype(jnp.bfloat16)
    b2 = jax.random.normal(k4, (C,), jnp.float32) * 0.02

    # tile_m=256 so the demo exercises a multi-step row grid (1024 rows -> 4 tiles).
    out = pallas_mlp(x, w1, b1, w2, b2, tile_m=256)
    jax.block_until_ready(out)
    assert out.shape == (B, L, C)

    # Pure-JAX reference with the same bf16-operand / f32-accumulate recipe.
    def ref(x2d):
        h = jnp.dot(x2d.astype(jnp.bfloat16), w1,
                    preferred_element_type=jnp.float32) + b1
        h = 0.5 * h * (1.0 + lax.erf(h / math.sqrt(2.0)))
        return jnp.dot(h.astype(jnp.bfloat16), w2,
                       preferred_element_type=jnp.float32) + b2

    expected = ref(x.reshape(-1, C)).reshape(B, L, C)
    max_err = float(jnp.max(jnp.abs(out - expected)))
    assert jnp.allclose(out, expected, atol=2e-2, rtol=2e-2), max_err

    print("KERNEL_OK")
</pallas_src>

<mosaic_0001>
module attributes {stable_mosaic.version = 11 : i64} {
  func.func @mlp_kernel(%arg0: i32, %arg1: memref<256x128xf32, #tpu.memory_space<vmem>>, %arg2: memref<128x512xbf16, #tpu.memory_space<vmem>>, %arg3: memref<1x512xf32, #tpu.memory_space<vmem>>, %arg4: memref<512x128xbf16, #tpu.memory_space<vmem>>, %arg5: memref<1x128xf32, #tpu.memory_space<vmem>>, %arg6: memref<256x128xf32, #tpu.memory_space<vmem>>) attributes {dimension_semantics = [#tpu.dimension_semantics<parallel>], iteration_bounds = array<i64: 4>, scalar_prefetch = 0 : i64, scratch_operands = 0 : i64, tpu.core_type = #tpu.core_type<tc>, window_params = [{transform_indices = @transform_0, window_bounds = array<i64: 256, 128>}, {pipeline_mode = #tpu.pipeline_mode<synchronous>, transform_indices = @transform_1, window_bounds = array<i64: 128, 512>}, {pipeline_mode = #tpu.pipeline_mode<synchronous>, transform_indices = @transform_2, window_bounds = array<i64: 1, 512>}, {pipeline_mode = #tpu.pipeline_mode<synchronous>, transform_indices = @transform_3, window_bounds = array<i64: 512, 128>}, {pipeline_mode = #tpu.pipeline_mode<synchronous>, transform_indices = @transform_4, window_bounds = array<i64: 1, 128>}, {transform_indices = @transform_5, window_bounds = array<i64: 256, 128>}]} {
    %c0 = arith.constant 0 : index
    %c0_0 = arith.constant 0 : index
    %0 = vector.load %arg1[%c0, %c0_0] : memref<256x128xf32, #tpu.memory_space<vmem>>, vector<256x128xf32>
    %1 = arith.truncf %0 : vector<256x128xf32> to vector<256x128xbf16>
    %c0_1 = arith.constant 0 : index
    %c0_2 = arith.constant 0 : index
    %2 = vector.load %arg2[%c0_1, %c0_2] : memref<128x512xbf16, #tpu.memory_space<vmem>>, vector<128x512xbf16>
    %cst = arith.constant dense<0.000000e+00> : vector<256x512xf32>
    %3 = tpu.matmul %1, %2, %cst {dimension_numbers = #tpu.dot_dimension_numbers<[1], [0], [0], [1], [0, 0, 1, 1], [], []>} : vector<256x128xbf16>, vector<128x512xbf16>, vector<256x512xf32> -> vector<256x512xf32>
    %c0_3 = arith.constant 0 : index
    %c0_4 = arith.constant 0 : index
    %4 = vector.load %arg3[%c0_3, %c0_4] : memref<1x512xf32, #tpu.memory_space<vmem>>, vector<1x512xf32>
    %5 = vector.broadcast %4 : vector<1x512xf32> to vector<256x512xf32>
    %6 = arith.addf %3, %5 : vector<256x512xf32>
    %cst_5 = arith.constant 5.000000e-01 : f32
    %7 = vector.broadcast %cst_5 : f32 to vector<256x512xf32>
    %8 = arith.mulf %7, %6 : vector<256x512xf32>
    %cst_6 = arith.constant 0.707106769 : f32
    %9 = vector.broadcast %cst_6 : f32 to vector<256x512xf32>
    %10 = arith.mulf %6, %9 : vector<256x512xf32>
    %11 = math.erf %10 : vector<256x512xf32>
    %cst_7 = arith.constant 1.000000e+00 : f32
    %12 = vector.broadcast %cst_7 : f32 to vector<256x512xf32>
    %13 = arith.addf %12, %11 : vector<256x512xf32>
    %14 = arith.mulf %8, %13 : vector<256x512xf32>
    %15 = arith.truncf %14 : vector<256x512xf32> to vector<256x512xbf16>
    %c0_8 = arith.constant 0 : index
    %c0_9 = arith.constant 0 : index
    %16 = vector.load %arg4[%c0_8, %c0_9] : memref<512x128xbf16, #tpu.memory_space<vmem>>, vector<512x128xbf16>
    %cst_10 = arith.constant dense<0.000000e+00> : vector<256x128xf32>
    %17 = tpu.matmul %15, %16, %cst_10 {dimension_numbers = #tpu.dot_dimension_numbers<[1], [0], [0], [1], [0, 0, 1, 1], [], []>} : vector<256x512xbf16>, vector<512x128xbf16>, vector<256x128xf32> -> vector<256x128xf32>
    %c0_11 = arith.constant 0 : index
    %c0_12 = arith.constant 0 : index
    %18 = vector.load %arg5[%c0_11, %c0_12] : memref<1x128xf32, #tpu.memory_space<vmem>>, vector<1x128xf32>
    %19 = vector.broadcast %18 : vector<1x128xf32> to vector<256x128xf32>
    %20 = arith.addf %17, %19 : vector<256x128xf32>
    %c0_13 = arith.constant 0 : index
    %c0_14 = arith.constant 0 : index
    %21 = vector.load %arg6[%c0_13, %c0_14] : memref<256x128xf32, #tpu.memory_space<vmem>>, vector<256x128xf32>
    tpu.vector_store %arg6[%c0_13, %c0_14], %20 {strides = array<i32>} : memref<256x128xf32, #tpu.memory_space<vmem>>, vector<256x128xf32>,
    return
  }
  func.func @transform_0(%arg0: i32) -> (i32, i32) {
    %c0_i32 = arith.constant 0 : i32
    %c0_i32_0 = arith.constant 0 : i32
    return %arg0, %c0_i32 : i32, i32
  }
  func.func @transform_1(%arg0: i32) -> (i32, i32) {
    %c0_i32 = arith.constant 0 : i32
    %c0_i32_0 = arith.constant 0 : i32
    %c0_i32_1 = arith.constant 0 : i32
    return %c0_i32, %c0_i32_0 : i32, i32
  }
  func.func @transform_2(%arg0: i32) -> (i32, i32) {
    %c0_i32 = arith.constant 0 : i32
    %c0_i32_0 = arith.constant 0 : i32
    %c0_i32_1 = arith.constant 0 : i32
    return %c0_i32, %c0_i32_0 : i32, i32
  }
  func.func @transform_3(%arg0: i32) -> (i32, i32) {
    %c0_i32 = arith.constant 0 : i32
    %c0_i32_0 = arith.constant 0 : i32
    %c0_i32_1 = arith.constant 0 : i32
    return %c0_i32, %c0_i32_0 : i32, i32
  }
  func.func @transform_4(%arg0: i32) -> (i32, i32) {
    %c0_i32 = arith.constant 0 : i32
    %c0_i32_0 = arith.constant 0 : i32
    %c0_i32_1 = arith.constant 0 : i32
    return %c0_i32, %c0_i32_0 : i32, i32
  }
  func.func @transform_5(%arg0: i32) -> (i32, i32) {
    %c0_i32 = arith.constant 0 : i32
    %c0_i32_0 = arith.constant 0 : i32
    return %arg0, %c0_i32 : i32, i32
  }
}

</mosaic_0001>

<bundles_post_ra>
// kernel: tpu_custom_call.1
= control target key start
LH: loop header
LB: loop body
LE: loop exit
PB: predicated region body
PF: predicated region fallthrough
CT: control target
= control target key end

     0   :  { %10 = vsyncpa [#allocation3], 0  ;;  %s4827_s0 = inlined_call_operand.hbm [shape: f32[1024,128], index: 0, kind: input, shape index: {}]   ;;  %s4828_s1 = inlined_call_operand.hbm [shape: bf16[128,512], index: 1, kind: input, shape index: {}]   ;;  %s4829_s2 = inlined_call_operand.hbm [shape: f32[1,512], index: 2, kind: input, shape index: {}]   ;;  %s4830_s3 = inlined_call_operand.hbm [shape: bf16[512,128], index: 3, kind: input, shape index: {}]   ;;  %s4831_s4 = inlined_call_operand.vmem [shape: f32[1,128], index: 4, kind: input, shape index: {}]   ;;  %s4832_s5 = inlined_call_operand.hbm [shape: f32[1024,128], index: 5, kind: output, shape index: {}]  }
   0x1   :  { %12 = vsyncpa [#allocation3 + $0x1], 0 }
   0x2   :  { %13 = vsyncpa [#allocation6], 0 }
   0x3   :  { %14 = vsyncpa [#allocation9], 0 }
   0x4   :  { %15 = vsyncpa [#allocation4], 0 }
   0x5   :  { %17 = vsyncpa [#allocation4 + $0x1], 0  ;;  %s3330_s18 = smov 0   ;;  %s3332_s19 = smov 0  }
   0x6   :  { %s3334_s20 = smov 0   ;;  %s3336_s21 = smov 0  }
   0x7 LB: > { %s3351_s22 = sadd.s32 4294967295, %s3284_s21   ;;  %s2373_s23 = sadd.s32 4294967294, %s3284_s21   ;;  %s3284_s21 = sphi %s3336_s21, %s4877_s21   ;;  %s3280_s20 = sphi %s3334_s20, %s4876_s20   ;;  %s3276_s19 = sphi %s3332_s19, %s4875_s19   ;;  %s3272_s18 = sphi %s3330_s18, %s4874_s18  }
   0x8   : > { %p43_p0 = scmp.ne.s32.totalorder %s3276_s19, %s3272_s18  ;;  %p4833_p1 = scmp.eq.s32.totalorder %s3351_s22, 0 }
   0x9   : > { %p157_p3 = scmp.eq.s32.totalorder %s2373_s23, 3  ;;  %p2374_p5 = scmp.ge.s32.totalorder %s3284_s21, 1 }
   0xa   : > { %p3360_p4 = por %p4833_p1, %p43_p0  ;;  %p164_p7 = scmp.lt.s32.totalorder %s3284_s21, 5 }
   0xb   : > { %p3365_p6 = por %p157_p3, %p43_p0  ;;  %s3286_s27 = smov [#allocation5]  }
   0xc   : > { %s4837_s24 = scalar_select %p3360_p4, 1, 0 }
   0xd   : > { %s4838_s25 = scalar_select %p3365_p6, 1, 0 }
   0xe   : > { %p3370_p8 = pnand %p2374_p5, %p164_p7  ;;  %s176_s28 = sshll.u32 %s3286_s27, 4  ;;  %s177_s28 = int_to_ptr.vmem [resolvable:$true] %s176_s28 }
   0xf   : > { %s3287_s30 = smov [#allocation7]   ;;  %s3288_s7 = smov [#allocation8]  }
  0x10   : > { %s4839_s26 = scalar_select %p3370_p8, 1, 0 }
  0x11   : > { %p2700_p9 = pneg %p3370_p8  ;;  %s190_s6 = sshll.u32 %s3287_s30, 4  ;;  %s191_s6 = int_to_ptr.vmem [resolvable:$true] %s190_s6 }
  0x12   : > { %s200_s8 = sshll.u32 %s3288_s7, 4  ;;  %s3117_s9 = scalar_lea.vmem %s177_s28, 4096  ;;  %s201_s8 = int_to_ptr.vmem [resolvable:$true] %s200_s8 }
  0x13   : > { %p3378_p10 = pnand %p2700_p9, %p4833_p1  ;;  %p3118_p12 = scmp.ne.s32.totalorder %s177_s28, %s3117_s9 }
  0x14   : > { %p3125_p3 = scmp.lt.s32.totalorder %s177_s28, %s177_s28  ;;  %p3126_p5 = scmp.lt.s32.totalorder %s3117_s9, %s3117_s9 }
  0x15   : > { %p3108_p11 = pneg %p3378_p10 }
  0x16   : > { %p3127_p7 = por %p3126_p5, %p3125_p3 }
  0x17   : > { %p3120_p13 = pnand %p3118_p12, %p3108_p11 }
  0x19   : > { %p3121_p0 = pneg %p3120_p13 }
  0x1b   : > { %p3128_p9 = pnand %p3127_p7, %p3121_p0 }
  0x1d   : > { %3131 = shalt.err (!%p3128_p9)
}
  0x1e   : > { %s3289_s10 = smov 256   ;;  %s3290_s11 = smov 16  }
  0x1f   : > { %2703 = dma.hbm_to_vmem [thread:$0]  (!%p3378_p10), %s4828_s1, 4096, %s177_s28, [#allocation6], %s3289_s10, %s3289_s10, %s3290_s11  }
  0x20   : > { %s3143_s14 = scalar_lea.vmem %s191_s6, 64  ;;  %p3151_p2 = scmp.lt.s32.totalorder %s191_s6, %s191_s6 }
  0x21   : > { %p3144_p1 = scmp.ne.s32.totalorder %s191_s6, %s3143_s14  ;;  %p3152_p6 = scmp.lt.s32.totalorder %s3143_s14, %s3143_s14 }
  0x23   : > { %p3146_p12 = pnand %p3144_p1, %p3108_p11  ;;  %p3153_p3 = por %p3152_p6, %p3151_p2 }
  0x25   : > { %p3147_p13 = pneg %p3146_p12 }
  0x27   : > { %p3154_p0 = pnand %p3153_p3, %p3147_p13 }
  0x29   : > { %3157 = shalt.err (!%p3154_p0)
}
  0x2a   : > { %2706 = dma.hbm_to_vmem [thread:$0]  (!%p3378_p10), %s4829_s2, 64, %s191_s6, [#allocation6]  }
  0x2b   : > { %s3169_s17 = scalar_lea.vmem %s201_s8, 4096  ;;  %p3177_p9 = scmp.lt.s32.totalorder %s201_s8, %s201_s8 }
  0x2c   : > { %p3170_p5 = scmp.ne.s32.totalorder %s201_s8, %s3169_s17  ;;  %p3178_p12 = scmp.lt.s32.totalorder %s3169_s17, %s3169_s17 }
  0x2e   : > { %p3172_p7 = pnand %p3170_p5, %p3108_p11  ;;  %p3179_p4 = por %p3178_p12, %p3177_p9 }
  0x30   : > { %p3173_p1 = pneg %p3172_p7 }
  0x32   : > { %p3180_p2 = pnand %p3179_p4, %p3173_p1 }
  0x34   : > { %3183 = shalt.err (!%p3180_p2)
}
  0x35   : > { %s3291_s23 = smov 64   ;;  %s3292_s27 = smov 4  }
  0x36   : > { %2709 = dma.hbm_to_vmem [thread:$0]  (!%p3378_p10), %s4830_s3, 4096, %s201_s8, [#allocation9], %s3291_s23, %s3291_s23, %s3292_s27  }
  0x37   : > { %s3409_s6 = sadd.s32 1, %s3284_s21   ;;  %s30_s9 = sadd.s32 1, %s3280_s20 }
  0x38   : > { %s27_s7 = ssub.s32 %s3284_s21, %s3409_s6  ;;  %p37_p6 = scmp.ne.s32.totalorder %s3280_s20, %s3276_s19 }
  0x39   : > { %p28_p4 = scmp.eq.s32.totalorder %s27_s7, 0  ;;  %p38_p11 = scmp.eq.s32.totalorder %s3284_s21, 0 }
  0x3a   : > { %p2721_p13 = scmp.lt.s32.totalorder %s3284_s21, 4  ;;  %p4841_p0 = scmp.eq.s32.totalorder %s3351_s22, 3 }
  0x3b   : > { %s3419_s10 = scalar_select %p28_p4, %s3280_s20, %s30_s9  }
  0x3c   : > { %p39_p3 = por %p38_p11, %p37_p6  ;;  %p3423_p5 = por %p4841_p0, %p37_p6 }
  0x3d   : > { %s217_s29 = sand.u32 1, %s3280_s20   ;;  %s2458_s12 = sshll.u32 %s3284_s21, 12 }
  0x3e   : > { %s4842_s11 = scalar_select %p3423_p5, 1, 0 }
  0x3f   : > { %s2379_s8 = sshll.u32 %s217_s29, 8  ;;  %s3432_s15 = scalar_lea.hbm %s4827_s0, %s2458_s12 }
  0x40   : > { %s221_s16 = scalar_lea.vmem [#allocation2], %s2379_s8  ;;  %p3434_p10 = pnand %p2721_p13, %p39_p3 }
  0x41   : > { %s228_s17 = sshll.u32 %s221_s16, 4  ;;  %s3440_s27 = scalar_lea.sflag [#allocation3], %s217_s29  ;;  %s3438_s17 = int_to_ptr.vmem [resolvable:$true] %s228_s17 }
  0x42   : > { %s3184_s28 = scalar_lea.hbm %s3432_s15, 4096  ;;  %p3186_p1 = pneg %p3434_p10 }
  0x43   : > { %p3185_p7 = scmp.ne.s32.totalorder %s3432_s15, %s3184_s28  ;;  %s3189_s9 = scalar_lea.hbm %s4827_s0, 16384 }
  0x44   : > { %p3190_p2 = scmp.lt.s32.totalorder %s3432_s15, %s4827_s0  ;;  %p3191_p4 = scmp.lt.s32.totalorder %s3189_s9, %s3184_s28 }
  0x45   : > { %p3187_p9 = pnand %p3186_p1, %p3185_p7 }
  0x46   : > { %p3192_p6 = por %p3191_p4, %p3190_p2 }
  0x47   : > { %p3188_p12 = pneg %p3187_p9 }
  0x49   : > { %p3193_p11 = pnand %p3192_p6, %p3188_p12 }
  0x4b   : > { %3196 = shalt.err (!%p3193_p11)
}
  0x4c   : > { %s3197_s29 = scalar_lea.vmem %s3438_s17, 4096  ;;  %s3293_s13 = smov [#allocation2]  }
  0x4d   : > { %p3198_p13 = scmp.ne.s32.totalorder %s3438_s17, %s3197_s29  ;;  %s3202_s14 = sshll.u32 %s3293_s13, 4  ;;  %s3203_s14 = int_to_ptr.vmem [resolvable:$false] %s3202_s14 }
  0x4e   : > { %s3204_s16 = scalar_lea.vmem %s3203_s14, 8192  ;;  %p3205_p7 = scmp.lt.s32.totalorder %s3438_s17, %s3203_s14 }
  0x4f   : > { %p3200_p3 = pnand %p3198_p13, %p3186_p1  ;;  %p3206_p9 = scmp.lt.s32.totalorder %s3204_s16, %s3197_s29 }
  0x51   : > { %p3201_p0 = pneg %p3200_p3  ;;  %p3207_p5 = por %p3206_p9, %p3205_p7 }
  0x53   : > { %p3208_p8 = pnand %p3207_p5, %p3201_p0 }
  0x55   : > { %3211 = shalt.err (!%p3208_p8)
}
  0x56   : > { %s3294_s28 = smov 128   ;;  %s3295_s30 = smov 8  }
  0x57   : > { %2713 = dma.hbm_to_vmem [thread:$0]  (!%p3434_p10), %s3432_s15, 4096, %s3438_s17, %s3440_s27, %s3294_s28, %s3294_s28, %s3295_s30  }
  0x58   : > { %p4844_p1 = scmp.ne.s32.totalorder %s4839_s26, 0 }
  0x5a   : > { %240 = sbr.rel (%p4844_p1) target bundleno = 774 (0x306), region = 40 }
  0x5f   : > { %s3464_s7 = sand.u32 1, %s3276_s19   ;;  %p4845_p8 = scmp.ne.s32.totalorder %s4837_s24, 0 }
  0x60   : > { %s2383_s9 = sshll.u32 %s3464_s7, 8  ;;  %s243_s12 = scalar_lea.sflag [#allocation3], %s3464_s7 }
  0x61   : > { %s3470_s8 = scalar_lea.vmem [#allocation2], %s2383_s9 }
  0x62   : > { %3255 = dma.done.wait (%p4845_p8), %s243_s12, 4096  }
  0x63   : > { %3257 = vsyncadd (%p4845_p8), %s243_s12, 4294963200  ;;  %p4846_p5 = scmp.eq.s32.totalorder %s3351_s22, 0 }
  0x65   : > { %3259 = dma.done.wait (%p4846_p5), [#allocation6], 4160   ;;  %p4847_p10 = pmov %p4846_p5 }
  0x66   : > { %p4848_p12 = pmov %p4846_p5 }
  0x67   : > { %3261 = vsyncadd (%p4847_p10), [#allocation6], 4294963136 }
  0x68   : > { %3263 = dma.done.wait (%p4848_p12), [#allocation9], 4096   ;;  %p4849_p2 = pmov %p4846_p5 }
  0x69   : > { %v3296_v0 = vmov 0   ;;  %v2770_v1 = vld [vmem:[#allocation5 + $0xe4] ss:$16 sps:$4 sm:$0xff]   ;;  %v2772_v2 = vld [vmem:[#allocation5 + $0xec] ss:$16 sps:$4 sm:$0xff]   ;;  %s4713_s15 = scalar_lea.vmem [#allocation10], %s2383_s9 }
  0x6a   : > { %3265 = vsyncadd (%p4849_p2), [#allocation9], 4294963200  ;;  %582 = vmatprep.mubr.bf16.mxu0 %v3296_v0  ;;  %775 = vmatprep.mubr.bf16.mxu1 %v3296_v0  ;;  %v2774_v3 = vld [vmem:[#allocation5 + $0xe0] ss:$16 sps:$4 sm:$0xff]   ;;  %v2775_v4 = vld [vmem:[#allocation5 + $0xe8] ss:$16 sps:$4 sm:$0xff]  }
  0x6b   : > { %550 = vmatprep.subr.bf16.mxu0 %v2770_v1  ;;  %743 = vmatprep.subr.bf16.mxu1 %v2772_v2  ;;  %v2776_v5 = vld [vmem:[#allocation5 + $0xc4] ss:$16 sps:$4 sm:$0xff]   ;;  %v2778_v6 = vld [vmem:[#allocation5 + $0xcc] ss:$16 sps:$4 sm:$0xff]   ;;  %v2780_v7 = vld [vmem:[#allocation5 + $0xc0] ss:$16 sps:$4 sm:$0xff]  }
  0x6c   : > { %551 = vmatpush1.bf16.msra.mxu0 %v2774_v3  ;;  %744 = vmatpush1.bf16.msra.mxu1 %v2775_v4  ;;  %v2781_v8 = vld [vmem:[#allocation5 + $0xc8] ss:$16 sps:$4 sm:$0xff]   ;;  %v2782_v9 = vld [vmem:[#allocation5 + $0xa4] ss:$16 sps:$4 sm:$0xff]   ;;  %v2784_v10 = vld [vmem:[#allocation5 + $0xac] ss:$16 sps:$4 sm:$0xff]  }
  0x6d   : > { %552 = vmatprep.subr.bf16.mxu0 %v2776_v5  ;;  %745 = vmatprep.subr.bf16.mxu1 %v2778_v6  ;;  %v2786_v11 = vld [vmem:[#allocation5 + $0xa0] ss:$16 sps:$4 sm:$0xff]   ;;  %v2787_v12 = vld [vmem:[#allocation5 + $0xa8] ss:$16 sps:$4 sm:$0xff]   ;;  %v2788_v13 = vld [vmem:[#allocation5 + $0x84] ss:$16 sps:$4 sm:$0xff]  }
  0x6e   : > { %v2790_v14 = vld [vmem:[#allocation5 + $0x8c] ss:$16 sps:$4 sm:$0xff]   ;;  %v2792_v15 = vld [vmem:[#allocation5 + $0x80] ss:$16 sps:$4 sm:$0xff]   ;;  %v2793_v16 = vld [vmem:[#allocation5 + $0x88] ss:$16 sps:$4 sm:$0xff]  }
  0x6f   : > { %v2794_v17 = vld [vmem:[#allocation5 + $0x64] ss:$16 sps:$4 sm:$0xff]   ;;  %v2796_v18 = vld [vmem:[#allocation5 + $0x6c] ss:$16 sps:$4 sm:$0xff]   ;;  %v2798_v19 = vld [vmem:[#allocation5 + $0x60] ss:$16 sps:$4 sm:$0xff]  }
  0x70   : > { %553 = vmatpush1.bf16.msra.mxu0 %v2780_v7  ;;  %746 = vmatpush1.bf16.msra.mxu1 %v2781_v8  ;;  %v2799_v20 = vld [vmem:[#allocation5 + $0x68] ss:$16 sps:$4 sm:$0xff]   ;;  %v2800_v21 = vld [vmem:[#allocation5 + $0x44] ss:$16 sps:$4 sm:$0xff]   ;;  %v2802_v22 = vld [vmem:[#allocation5 + $0x4c] ss:$16 sps:$4 sm:$0xff]  }
  0x71   : > { %554 = vmatprep.subr.bf16.mxu0 %v2782_v9  ;;  %747 = vmatprep.subr.bf16.mxu1 %v2784_v10  ;;  %v2804_v23 = vld [vmem:[#allocation5 + $0x40] ss:$16 sps:$4 sm:$0xff]   ;;  %v2805_v24 = vld [vmem:[#allocation5 + $0x48] ss:$16 sps:$4 sm:$0xff]   ;;  %v2806_v25 = vld [vmem:[#allocation5 + $0x24] ss:$16 sps:$4 sm:$0xff]  }
  0x72   : > { %v2808_v26 = vld [vmem:[#allocation5 + $0x2c] ss:$16 sps:$4 sm:$0xff]   ;;  %v2810_v27 = vld [vmem:[#allocation5 + $0x20] ss:$16 sps:$4 sm:$0xff]   ;;  %v2811_v28 = vld [vmem:[#allocation5 + $0x28] ss:$16 sps:$4 sm:$0xff]  }
  0x73   : > { %v2812_v29 = vld [vmem:[#allocation5 + $0x4] ss:$16 sps:$4 sm:$0xff]   ;;  %v2814_v30 = vld [vmem:[#allocation5 + $0xc] ss:$16 sps:$4 sm:$0xff]   ;;  %v2816_v31 = vld [vmem:[#allocation5] ss:$16 sps:$4 sm:$0xff]  }
  0x74   : > { %555 = vmatpush1.bf16.msra.mxu0 %v2786_v11  ;;  %748 = vmatpush1.bf16.msra.mxu1 %v2787_v12  ;;  %v2817_v32 = vld [vmem:[#allocation5 + $0x8] ss:$16 sps:$4 sm:$0xff]   ;;  %v288_v33 = vld [vmem:[%s3470_s8] sm:$0xff]  ;;  %v290_v40 = vld [vmem:[%s3470_s8 + $0x10] sm:$0xff]  ;;  %s2459_s17 = sshll.u32 %s3351_s22, 12  ;;  %s2271_s23 = sshll.u32 %s4713_s15, 4  ;;  %s4784_s23 = int_to_ptr.vmem [resolvable:$true] %s2271_s23 }
  0x75   : > { %556 = vmatprep.subr.bf16.mxu0 %v2788_v13  ;;  %749 = vmatprep.subr.bf16.mxu1 %v2790_v14  ;;  %v289_v34 = vld [vmem:[%s3470_s8 + $0x8] sm:$0xff]  ;;  %v2818_v35 = vld [vmem:[#allocation8 + $0x78] sm:$0xff]   ;;  %v2822_v41 = vld [vmem:[#allocation8 + $0x70] sm:$0xff]   ;;  %s4782_s13 = scalar_lea.hbm %s4832_s5, %s2459_s17  ;;  %s2258_s14 = scalar_lea.sflag [#allocation4], %s3464_s7 }
  0x76   : > { %v320_v36 = vpack.c.bf16 %v289_v34, %v288_v33  ;;  %v2819_v37 = vld [vmem:[#allocation8 + $0x38] sm:$0xff]   ;;  %v2823_v43 = vld [vmem:[#allocation8 + $0x30] sm:$0xff]   ;;  %v2826_v47 = vld [vmem:[#allocation8 + $0x68] sm:$0xff]   ;;  %s3212_s16 = scalar_lea.vmem %s4784_s23, 4096  ;;  %p4872_p6 = scmp.ne.s32.totalorder %s4842_s11, 0 }
  0x77   : > { %v2820_v38 = vld [vmem:[#allocation8 + $0xf8] sm:$0xff]   ;;  %v2824_v44 = vld [vmem:[#allocation8 + $0xf0] sm:$0xff]   ;;  %v2827_v48 = vld [vmem:[#allocation8 + $0x28] sm:$0xff]   ;;  %p3213_p4 = scmp.ne.s32.totalorder %s4784_s23, %s3212_s16  ;;  %s3297_s22 = smov [#allocation10]  }
  0x78   : > { %557 = vmatpush1.bf16.msra.mxu0 %v2792_v15  ;;  %750 = vmatpush1.bf16.msra.mxu1 %v2793_v16  ;;  %v2821_v39 = vld [vmem:[#allocation8 + $0xb8] sm:$0xff]   ;;  %v2825_v46 = vld [vmem:[#allocation8 + $0xb0] sm:$0xff]   ;;  %v293_v50 = vld [vmem:[%s3470_s8 + $0x28] sm:$0xff]  ;;  %s3216_s28 = sshll.u32 %s3297_s22, 4  ;;  %s3217_s28 = int_to_ptr.vmem [resolvable:$false] %s3216_s28 }
  0x79   : > { %558 = vmatprep.subr.bf16.mxu0 %v2794_v17  ;;  %751 = vmatprep.subr.bf16.mxu1 %v2796_v18  ;;  %v291_v42 = vld [vmem:[%s3470_s8 + $0x18] sm:$0xff]  ;;  %v292_v49 = vld [vmem:[%s3470_s8 + $0x20] sm:$0xff]  ;;  %v2828_v51 = vld [vmem:[#allocation8 + $0xe8] sm:$0xff]   ;;  %p3214_p11 = pnand %p3213_p4, %p4872_p6  ;;  %s3218_s30 = scalar_lea.vmem %s3217_s28, 8192 }
  0x7a   : > { %v321_v45 = vpack.c.bf16 %v291_v42, %v290_v40  ;;  %v2829_v52 = vld [vmem:[#allocation8 + $0xa8] sm:$0xff]   ;;  %v2830_v53 = vld [vmem:[#allocation8 + $0x60] sm:$0xff]   ;;  %v322_v56 = vpack.c.bf16 %v293_v50, %v292_v49  ;;  %v2834_v58 = vld [vmem:[#allocation8 + $0x58] sm:$0xff]   ;;  %v370_v50 = vlaneseq  ;;  %p3219_p3 = scmp.lt.s32.totalorder %s4784_s23, %s3217_s28  ;;  %p3220_p0 = scmp.lt.s32.totalorder %s3218_s30, %s3212_s16 }
  0x7b   : > { %v2831_v54 = vld [vmem:[#allocation8 + $0x20] sm:$0xff]   ;;  %v2835_v59 = vld [vmem:[#allocation8 + $0x18] sm:$0xff]   ;;  %v294_v60 = vld [vmem:[%s3470_s8 + $0x30] sm:$0xff]  ;;  %p3215_p13 = pneg %p3214_p11 }
  0x7c   : > { %559 = vmatpush1.bf16.msra.mxu0 %v2798_v19  ;;  %752 = vmatpush1.bf16.msra.mxu1 %v2799_v20  ;;  %v2832_v55 = vld [vmem:[#allocation8 + $0xe0] sm:$0xff]   ;;  %v295_v61 = vld [vmem:[%s3470_s8 + $0x38] sm:$0xff]  ;;  %v2842_v6 = vld [vmem:[#allocation8 + $0x48] sm:$0xff]   ;;  %p3221_p7 = por %p3220_p0, %p3219_p3 }
  0x7d   : > { %560 = vmatprep.subr.bf16.mxu0 %v2800_v21  ;;  %753 = vmatprep.subr.bf16.mxu1 %v2802_v22  ;;  %v2833_v57 = vld [vmem:[#allocation8 + $0xa0] sm:$0xff]   ;;  %v2836_v62 = vld [vmem:[#allocation8 + $0xd8] sm:$0xff]   ;;  %v2838_v1 = vld [vmem:[#allocation8 + $0x50] sm:$0xff]   ;;  %v323_v4 = vpack.c.bf16 %v295_v61, %v294_v60 }
  0x7e   : > { %v2837_v63 = vld [vmem:[#allocation8 + $0x98] sm:$0xff]   ;;  %v2839_v2 = vld [vmem:[#allocation8 + $0x10] sm:$0xff]   ;;  %v297_v8 = vld [vmem:[%s3470_s8 + $0x48] sm:$0xff]  ;;  %p3222_p9 = pnand %p3221_p7, %p3215_p13 }
  0x7f   : > { %v2840_v3 = vld [vmem:[#allocation8 + $0xd0] sm:$0xff]   ;;  %v296_v7 = vld [vmem:[%s3470_s8 + $0x40] sm:$0xff]  ;;  %v301_v14 = vld [vmem:[%s3470_s8 + $0x68] sm:$0xff] }
  0x80   : > { %561 = vmatpush1.bf16.msra.mxu0 %v2804_v23  ;;  %754 = vmatpush1.bf16.msra.mxu1 %v2805_v24  ;;  %v2841_v5 = vld [vmem:[#allocation8 + $0x90] sm:$0xff]   ;;  %v324_v9 = vpack.c.bf16 %v297_v8, %v296_v7  ;;  %v300_v13 = vld [vmem:[%s3470_s8 + $0x60] sm:$0xff]  ;;  %v305_v20 = vld [vmem:[%s3470_s8 + $0x88] sm:$0xff] }
  0x81   : > { %562 = vmatprep.subr.bf16.mxu0 %v2806_v25  ;;  %755 = vmatprep.subr.bf16.mxu1 %v2808_v26  ;;  %v298_v10 = vld [vmem:[%s3470_s8 + $0x50] sm:$0xff]  ;;  %v299_v11 = vld [vmem:[%s3470_s8 + $0x58] sm:$0xff]  ;;  %v326_v15 = vpack.c.bf16 %v301_v14, %v300_v13  ;;  %v304_v19 = vld [vmem:[%s3470_s8 + $0x80] sm:$0xff] }
  0x82   : > { %v325_v12 = vpack.c.bf16 %v299_v11, %v298_v10  ;;  %v302_v16 = vld [vmem:[%s3470_s8 + $0x70] sm:$0xff]  ;;  %v303_v17 = vld [vmem:[%s3470_s8 + $0x78] sm:$0xff]  ;;  %v328_v21 = vpack.c.bf16 %v305_v20, %v304_v19  ;;  %v308_v25 = vld [vmem:[%s3470_s8 + $0xa0] sm:$0xff] }
  0x83   : > { %v327_v18 = vpack.c.bf16 %v303_v17, %v302_v16  ;;  %v306_v22 = vld [vmem:[%s3470_s8 + $0x90] sm:$0xff]  ;;  %v307_v23 = vld [vmem:[%s3470_s8 + $0x98] sm:$0xff]  ;;  %v309_v26 = vld [vmem:[%s3470_s8 + $0xa8] sm:$0xff] }
  0x84   : > { %563 = vmatpush1.bf16.msra.mxu0 %v2810_v27  ;;  %756 = vmatpush1.bf16.msra.mxu1 %v2811_v28  ;;  %v329_v24 = vpack.c.bf16 %v307_v23, %v306_v22  ;;  %v330_v27 = vpack.c.bf16 %v309_v26, %v308_v25  ;;  %v310_v28 = vld [vmem:[%s3470_s8 + $0xb0] sm:$0xff]  ;;  %v312_v33 = vld [vmem:[%s3470_s8 + $0xc0] sm:$0xff]  ;;  %v313_v34 = vld [vmem:[%s3470_s8 + $0xc8] sm:$0xff] }
  0x85   : > { %564 = vmatprep.subr.bf16.mxu0 %v2812_v29  ;;  %757 = vmatprep.subr.bf16.mxu1 %v2814_v30  ;;  %v311_v29 = vld [vmem:[%s3470_s8 + $0xb8] sm:$0xff]  ;;  %v2849_v40 = vld [vmem:[#allocation8 + $0x80] sm:$0xff]  }
  0x86   : > { %v331_v30 = vpack.c.bf16 %v311_v29, %v310_v28  ;;  %v315_v42 = vld [vmem:[%s3470_s8 + $0xd8] sm:$0xff] }
  0x88   : > { %565 = vmatpush1.bf16.msra.mxu0 %v2816_v31  ;;  %758 = vmatpush1.bf16.msra.mxu1 %v2817_v32  ;;  %v2843_v31 = vld [vmem:[#allocation8 + $0x8] sm:$0xff]  }
  0x89   : > { %2460 = vmatprep.subr.bf16.mxu0 %v2818_v35  ;;  %2572 = vmatprep.subr.bf16.mxu1 %v2820_v38  ;;  %v2844_v32 = vld [vmem:[#allocation8 + $0xc8] sm:$0xff]   ;;  %v2848_v38 = vld [vmem:[#allocation8 + $0xc0] sm:$0xff]  }
  0x8a   : > { %v2845_v35 = vld [vmem:[#allocation8 + $0x88] sm:$0xff]  }
  0x8b   : > { %583 = vmatmul.mubr.bf16.vlgmr.msra.gmra.mxu0 %v320_v36  ;;  %776 = vmatmul.mubr.bf16.vlgmr.msra.gmra.mxu1 %v320_v36  ;;  %v332_v36 = vpack.c.bf16 %v313_v34, %v312_v33 }
  0x8c   : > { %592 = vmatprep.mubr.bf16.mxu0 %v3296_v0  ;;  %785 = vmatprep.mubr.bf16.mxu1 %v3296_v0 }
  0x8d   : > { %2461 = vmatpush3.bf16.msra.mxu0 %v2819_v37  ;;  %2573 = vmatpush3.bf16.msra.mxu1 %v2821_v39  ;;  %v2846_v37 = vld [vmem:[#allocation8 + $0x40] sm:$0xff]  }
  0x8e   : > { %2462 = vmatprep.subr.bf16.mxu0 %v2822_v41  ;;  %2574 = vmatprep.subr.bf16.mxu1 %v2824_v44  ;;  %v2847_v39 = vld [vmem:[#allocation8] sm:$0xff]   ;;  %v314_v41 = vld [vmem:[%s3470_s8 + $0xd0] sm:$0xff] }
  0x8f   : > { %v316_v44 = vld [vmem:[%s3470_s8 + $0xe0] sm:$0xff] }
  0x91   : > { %2463 = vmatpush3.bf16.msra.mxu0 %v2823_v43  ;;  %2575 = vmatpush3.bf16.msra.mxu1 %v2825_v46  ;;  %v333_v43 = vpack.c.bf16 %v315_v42, %v314_v41 }
  0x92   : > { %2464 = vmatprep.subr.bf16.mxu0 %v2826_v47  ;;  %2576 = vmatprep.subr.bf16.mxu1 %v2828_v51  ;;  %v318_v47 = vld [vmem:[%s3470_s8 + $0xf0] sm:$0xff]  ;;  %v371_v51 = vshrl.u32 %v370_v50, 7 }
  0x93   : > { %593 = vmatmul.mubr.bf16.gmra.mxu0 %v321_v45  ;;  %786 = vmatmul.mubr.bf16.gmra.mxu1 %v321_v45  ;;  %v317_v45 = vld [vmem:[%s3470_s8 + $0xe8] sm:$0xff] }
  0x94   : > { %602 = vmatprep.mubr.bf16.mxu0 %v3296_v0  ;;  %795 = vmatprep.mubr.bf16.mxu1 %v3296_v0  ;;  %v334_v46 = vpack.c.bf16 %v317_v45, %v316_v44 }
  0x95   : > { %2465 = vmatpush3.bf16.msra.mxu0 %v2827_v48  ;;  %2577 = vmatpush3.bf16.msra.mxu1 %v2829_v52  ;;  %v319_v48 = vld [vmem:[%s3470_s8 + $0xf8] sm:$0xff]  ;;  %v372_v52 = vsub.s32 0, %v371_v51 }
  0x96   : > { %2466 = vmatprep.subr.bf16.mxu0 %v2830_v53  ;;  %2578 = vmatprep.subr.bf16.mxu1 %v2832_v55  ;;  %v335_v49 = vpack.c.bf16 %v319_v48, %v318_v47  ;;  %v368_v53 = vld [vmem:[#allocation7] sm:$0xf]  ;;  %v376_v55 = vsub.s32 1, %v371_v51 }
  0x98   : > { %v3552_v61 = vrot.slane %v368_v53, %v376_v55 }
  0x99   : > { %2467 = vmatpush3.bf16.msra.mxu0 %v2831_v54  ;;  %2579 = vmatpush3.bf16.msra.mxu1 %v2833_v57  ;;  %v380_v54 = vsub.s32 2, %v371_v51  ;;  %v3548_v57 = vrot.slane %v368_v53, %v372_v52 }
  0x9a   : > { %2468 = vmatprep.subr.bf16.mxu0 %v2834_v58  ;;  %2580 = vmatprep.subr.bf16.mxu1 %v2836_v62 }
  0x9b   : > { %603 = vmatmul.mubr.bf16.gmra.mxu0 %v322_v56  ;;  %796 = vmatmul.mubr.bf16.gmra.mxu1 %v322_v56  ;;  %v384_v56 = vsub.s32 3, %v371_v51  ;;  %v3550_v60 = vrot.slane %v368_v53, %v380_v54 }
  0x9c   : > { %612 = vmatprep.mubr.bf16.mxu0 %v3296_v0  ;;  %805 = vmatprep.mubr.bf16.mxu1 %v3296_v0 }
  0x9d   : > { %2469 = vmatpush3.bf16.msra.mxu0 %v2835_v59  ;;  %2581 = vmatpush3.bf16.msra.mxu1 %v2837_v63  ;;  %v3554_v63 = vrot.slane %v368_v53, %v384_v56 }
  0x9e   : > { %2470 = vmatprep.subr.bf16.mxu0 %v2838_v1  ;;  %2582 = vmatprep.subr.bf16.mxu1 %v2840_v3 }
  0xa1   : > { %2471 = vmatpush3.bf16.msra.mxu0 %v2839_v2  ;;  %2583 = vmatpush3.bf16.msra.mxu1 %v2841_v5 }
  0xa2   : > { %2472 = vmatprep.subr.bf16.mxu0 %v2842_v6  ;;  %2584 = vmatprep.subr.bf16.mxu1 %v2844_v32 }
  0xa3   : > { %613 = vmatmul.mubr.bf16.gmra.mxu0 %v323_v4  ;;  %806 = vmatmul.mubr.bf16.gmra.mxu1 %v323_v4 }
  0xa4   : > { %622 = vmatprep.mubr.bf16.mxu0 %v3296_v0  ;;  %815 = vmatprep.mubr.bf16.mxu1 %v3296_v0 }
  0xa5   : > { %2473 = vmatpush3.bf16.msra.mxu0 %v2843_v31  ;;  %2585 = vmatpush3.bf16.msra.mxu1 %v2845_v35 }
  0xa6   : > { %2474 = vmatprep.subr.bf16.mxu0 %v2846_v37  ;;  %2586 = vmatprep.subr.bf16.mxu1 %v2848_v38 }
  0xa9   : > { %2475 = vmatpush3.bf16.msra.mxu0 %v2847_v39  ;;  %2587 = vmatpush3.bf16.msra.mxu1 %v2849_v40 }
  0xab   : > { %623 = vmatmul.mubr.bf16.gmra.mxu0 %v324_v9  ;;  %816 = vmatmul.mubr.bf16.gmra.mxu1 %v324_v9 }
  0xac   : > { %632 = vmatprep.mubr.bf16.mxu0 %v3296_v0  ;;  %825 = vmatprep.mubr.bf16.mxu1 %v3296_v0 }
  0xb3   : > { %633 = vmatmul.mubr.bf16.gmra.mxu0 %v325_v12  ;;  %826 = vmatmul.mubr.bf16.gmra.mxu1 %v325_v12 }
  0xb4   : > { %642 = vmatprep.mubr.bf16.mxu0 %v3296_v0  ;;  %835 = vmatprep.mubr.bf16.mxu1 %v3296_v0 }
  0xbb   : > { %643 = vmatmul.mubr.bf16.gmra.mxu0 %v326_v15  ;;  %836 = vmatmul.mubr.bf16.gmra.mxu1 %v326_v15 }
  0xbc   : > { %652 = vmatprep.mubr.bf16.mxu0 %v3296_v0  ;;  %845 = vmatprep.mubr.bf16.mxu1 %v3296_v0 }
  0xc3   : > { %653 = vmatmul.mubr.bf16.gmra.mxu0 %v327_v18  ;;  %846 = vmatmul.mubr.bf16.gmra.mxu1 %v327_v18 }
  0xc4   : > { %662 = vmatprep.mubr.bf16.mxu0 %v3296_v0  ;;  %855 = vmatprep.mubr.bf16.mxu1 %v3296_v0 }
  0xcb   : > { %663 = vmatmul.mubr.bf16.gmra.mxu0 %v328_v21  ;;  %856 = vmatmul.mubr.bf16.gmra.mxu1 %v328_v21 }
  0xcc   : > { %672 = vmatprep.mubr.bf16.mxu0 %v3296_v0  ;;  %865 = vmatprep.mubr.bf16.mxu1 %v3296_v0 }
  0xd3   : > { %673 = vmatmul.mubr.bf16.gmra.mxu0 %v329_v24  ;;  %866 = vmatmul.mubr.bf16.gmra.mxu1 %v329_v24 }
  0xd4   : > { %682 = vmatprep.mubr.bf16.mxu0 %v3296_v0  ;;  %875 = vmatprep.mubr.bf16.mxu1 %v3296_v0 }
  0xdb   : > { %683 = vmatmul.mubr.bf16.gmra.mxu0 %v330_v27  ;;  %876 = vmatmul.mubr.bf16.gmra.mxu1 %v330_v27 }
  0xdc   : > { %692 = vmatprep.mubr.bf16.mxu0 %v3296_v0  ;;  %885 = vmatprep.mubr.bf16.mxu1 %v3296_v0 }
  0xe3   : > { %693 = vmatmul.mubr.bf16.gmra.mxu0 %v331_v30  ;;  %886 = vmatmul.mubr.bf16.gmra.mxu1 %v331_v30 }
  0xe4   : > { %702 = vmatprep.mubr.bf16.mxu0 %v3296_v0  ;;  %895 = vmatprep.mubr.bf16.mxu1 %v3296_v0 }
  0xeb   : > { %703 = vmatmul.mubr.bf16.gmra.mxu0 %v332_v36  ;;  %896 = vmatmul.mubr.bf16.gmra.mxu1 %v332_v36 }
  0xec   : > { %712 = vmatprep.mubr.bf16.mxu0 %v3296_v0  ;;  %905 = vmatprep.mubr.bf16.mxu1 %v3296_v0 }
  0xf3   : > { %713 = vmatmul.mubr.bf16.gmra.mxu0 %v333_v43  ;;  %906 = vmatmul.mubr.bf16.gmra.mxu1 %v333_v43 }
  0xf4   : > { %722 = vmatprep.mubr.bf16.mxu0 %v3296_v0  ;;  %915 = vmatprep.mubr.bf16.mxu1 %v3296_v0 }
  0xfb   : > { %723 = vmatmul.mubr.bf16.gmra.mxu0 %v334_v46  ;;  %916 = vmatmul.mubr.bf16.gmra.mxu1 %v334_v46 }
  0xfc   : > { %732 = vmatprep.mubr.bf16.mxu0 %v3296_v0  ;;  %925 = vmatprep.mubr.bf16.mxu1 %v3296_v0 }
 0x103   : > { %733 = vmatmul.mubr.bf16.gmra.mxu0 %v335_v49  ;;  %926 = vmatmul.mubr.bf16.gmra.mxu1 %v335_v49 }
 0x14b   : > { %v584_v58 = vpop.f32.mrf.mxu0  ;;  %v777_v59 = vpop.f32.mrf.mxu1 }
 0x14c   : > { %v585_v1 = vadd.f32 %v584_v58, %v3548_v57  ;;  %v778_v4 = vadd.f32 %v777_v59, %v3550_v60 }
 0x14d   : > { %v586_v0 = vpop.f32.mrf.mxu0  ;;  %v779_v62 = vpop.f32.mrf.mxu1 }
 0x14e   : > { %v587_v5 = vadd.f32 %v586_v0, %v3552_v61  ;;  %v780_v8 = vadd.f32 %v779_v62, %v3554_v63  ;;  %v1064_v9 = vmul.f32 0.70710677, %v585_v1  ;;  %v1066_v13 = vmul.f32 0.70710677, %v778_v4 }
 0x14f   : > { %v588_v2 = vpop.f32.mrf.mxu0  ;;  %v781_v3 = vpop.f32.mrf.mxu1  ;;  %v936_v47 = vmul.f32 0.5, %v585_v1  ;;  %v938_v50 = vmul.f32 0.5, %v778_v4 }
 0x150   : > { %v589_v10 = vadd.f32 %v588_v2, %v3548_v57  ;;  %v1065_v14 = vmul.f32 0.70710677, %v587_v5  ;;  %v782_v15 = vadd.f32 %v781_v3, %v3550_v60  ;;  %v1067_v18 = vmul.f32 0.70710677, %v780_v8 }
 0x151   : > { %v590_v6 = vpop.f32.mrf.mxu0  ;;  %v783_v7 = vpop.f32.mrf.mxu1  ;;  %2850 = verf.f32 %v1064_v9  ;;  %v937_v51 = vmul.f32 0.5, %v587_v5  ;;  %v3577_v52 = vmul.f32 0.5, %v780_v8 }
 0x152   : > { %v591_v19 = vadd.f32 %v590_v6, %v3552_v61  ;;  %v1068_v20 = vmul.f32 0.70710677, %v589_v10  ;;  %v784_v21 = vadd.f32 %v783_v7, %v3554_v63  ;;  %2852 = verf.f32 %v1066_v13 }
 0x153   : > { %v594_v11 = vpop.f32.mrf.mxu0  ;;  %v787_v12 = vpop.f32.mrf.mxu1  ;;  %2854 = verf.f32 %v1065_v14  ;;  %v1070_v25 = vmul.f32 0.70710677, %v782_v15  ;;  %v3584_v58 = vmul.f32 0.5, %v589_v10  ;;  %v3586_v59 = vmul.f32 0.5, %v782_v15 }
 0x154   : > { %v595_v24 = vadd.f32 %v594_v11, %v3548_v57  ;;  %v788_v26 = vadd.f32 %v787_v12, %v3550_v60  ;;  %2856 = verf.f32 %v1067_v18  ;;  %v1069_v29 = vmul.f32 0.70710677, %v591_v19 }
 0x155   : > { %v596_v16 = vpop.f32.mrf.mxu0  ;;  %v789_v17 = vpop.f32.mrf.mxu1  ;;  %2858 = verf.f32 %v1068_v20  ;;  %v1071_v31 = vmul.f32 0.70710677, %v784_v21  ;;  %v3589_v1 = vmul.f32 0.5, %v591_v19  ;;  %v3591_v2 = vmul.f32 0.5, %v784_v21 }
 0x156   : > { %v597_v30 = vadd.f32 %v596_v16, %v3552_v61  ;;  %v1072_v34 = vmul.f32 0.70710677, %v595_v24  ;;  %v790_v35 = vadd.f32 %v789_v17, %v3554_v63  ;;  %2860 = verf.f32 %v1070_v25 }
 0x157   : > { %v598_v22 = vpop.f32.mrf.mxu0  ;;  %v791_v23 = vpop.f32.mrf.mxu1  ;;  %v1074_v36 = vmul.f32 0.70710677, %v788_v26  ;;  %2862 = verf.f32 %v1069_v29  ;;  %v3593_v3 = vmul.f32 0.5, %v595_v24  ;;  %v3599_v8 = vmul.f32 0.5, %v788_v26 }
 0x158   : > { %v1073_v39 = vmul.f32 0.70710677, %v597_v30  ;;  %v599_v40 = vadd.f32 %v598_v22, %v3548_v57  ;;  %2864 = verf.f32 %v1071_v31  ;;  %v1075_v43 = vmul.f32 0.70710677, %v790_v35 }
 0x159   : > { %v600_v27 = vpop.f32.mrf.mxu0  ;;  %v793_v28 = vpop.f32.mrf.mxu1  ;;  %2866 = verf.f32 %v1072_v34  ;;  %v792_v44 = vadd.f32 %v791_v23, %v3550_v60  ;;  %v3602_v12 = vmul.f32 0.5, %v597_v30  ;;  %v3604_v13 = vmul.f32 0.5, %v790_v35 }
 0x15a   : > { %2868 = verf.f32 %v1074_v36  ;;  %v1076_v48 = vmul.f32 0.70710677, %v599_v40  ;;  %v601_v49 = vadd.f32 %v600_v27, %v3552_v61  ;;  %v794_v53 = vadd.f32 %v793_v28, %v3554_v63 }
 0x15b   : > { %v604_v32 = vpop.f32.mrf.mxu0  ;;  %v797_v33 = vpop.f32.mrf.mxu1  ;;  %2870 = verf.f32 %v1073_v39  ;;  %v1078_v4 = vmul.f32 0.70710677, %v792_v44  ;;  %v3606_v14 = vmul.f32 0.5, %v599_v40  ;;  %v3612_v20 = vmul.f32 0.5, %v792_v44 }
 0x15c   : > { %2872 = verf.f32 %v1075_v43  ;;  %v605_v0 = vadd.f32 %v604_v32, %v3548_v57  ;;  %v1077_v9 = vmul.f32 0.70710677, %v601_v49  ;;  %v798_v10 = vadd.f32 %v797_v33, %v3550_v60 }
 0x15d   : > { %v606_v37 = vpop.f32.mrf.mxu0  ;;  %v799_v38 = vpop.f32.mrf.mxu1  ;;  %2874 = verf.f32 %v1076_v48  ;;  %v1079_v15 = vmul.f32 0.70710677, %v794_v53  ;;  %v3615_v25 = vmul.f32 0.5, %v601_v49  ;;  %v3622_v34 = vmul.f32 0.5, %v794_v53 }
 0x15e   : > { %v2851_v56 = vpop.eup %2850  ;;  %v1080_v21 = vmul.f32 0.70710677, %v605_v0  ;;  %v607_v22 = vadd.f32 %v606_v37, %v3552_v61  ;;  %2876 = verf.f32 %v1078_v4  ;;  %v1082_v30 = vmul.f32 0.70710677, %v798_v10 }
 0x15f   : > { %v608_v41 = vpop.f32.mrf.mxu0  ;;  %v3569_v42 = vpop.f32.mrf.mxu1  ;;  %v1320_v19 = vadd.f32 1.0, %v2851_v56  ;;  %2878 = verf.f32 %v1077_v9  ;;  %v800_v31 = vadd.f32 %v799_v38, %v3554_v63  ;;  %v3631_v43 = vmul.f32 0.5, %v605_v0 }
 0x160   : > { %v2853_v62 = vpop.eup %2852  ;;  %2880 = verf.f32 %v1079_v15  ;;  %v609_v35 = vadd.f32 %v608_v41, %v3548_v57  ;;  %v1081_v44 = vmul.f32 0.70710677, %v607_v22  ;;  %v3637_v56 = vmul.f32 0.5, %v798_v10 }
 0x161   : > { %v3572_v45 = vpop.f32.mrf.mxu0  ;;  %v3574_v46 = vpop.f32.mrf.mxu1  ;;  %v1322_v23 = vadd.f32 1.0, %v2853_v62  ;;  %v3629_v40 = vmul.f32 %v1320_v19, %v936_v47  ;;  %2882 = verf.f32 %v1080_v21  ;;  %v1083_v0 = vmul.f32 0.70710677, %v800_v31 }
 0x162   : > { %v2855_v7 = vpop.eup %2854  ;;  %2884 = verf.f32 %v1082_v30  ;;  %v3651_v9 = vmul.f32 0.5, %v607_v22  ;;  %v1084_v10 = vmul.f32 0.70710677, %v609_v35  ;;  %v3659_v19 = vmul.f32 0.5, %v800_v31 }
 0x163   : > { %v3580_v54 = vpop.f32.mrf.mxu0  ;;  %v3582_v55 = vpop.f32.mrf.mxu1  ;;  %v1321_v24 = vadd.f32 1.0, %v2855_v7  ;;  %v3633_v38 = vmul.f32 %v1322_v23, %v938_v50  ;;  %v802_v7 = vadd.f32 %v3569_v42, %v3550_v60  ;;  %2886 = verf.f32 %v1081_v44 }
 0x164   : > { %v2857_v11 = vpop.eup %2856  ;;  %v3663_v42 = vadd.f32 %v3574_v46, %v3554_v63  ;;  %2888 = verf.f32 %v1083_v0 }
 0x165   : > { %v3595_v5 = vpop.f32.mrf.mxu0  ;;  %v3597_v6 = vpop.f32.mrf.mxu1  ;;  %v1323_v29 = vadd.f32 1.0, %v2857_v11  ;;  %v3635_v49 = vmul.f32 %v1321_v24, %v937_v51  ;;  %v611_v11 = vadd.f32 %v3572_v45, %v3552_v61  ;;  %v3668_v24 = vmul.f32 0.5, %v609_v35 }
 0x166   : > { %v2859_v18 = vpop.eup %2858  ;;  %v1086_v31 = vmul.f32 0.70710677, %v802_v7  ;;  %2890 = verf.f32 %v1084_v10 }
 0x167   : > { %v3608_v16 = vpop.f32.mrf.mxu0  ;;  %v3610_v17 = vpop.f32.mrf.mxu1  ;;  %v1324_v33 = vadd.f32 1.0, %v2859_v18  ;;  %v3644_v47 = vmul.f32 %v1323_v29, %v3577_v52 }
 0x168   : > { %v2861_v28 = vpop.eup %2860  ;;  %2892 = verf.f32 %v1086_v31 }
 0x169   : > { %v3617_v26 = vpop.f32.mrf.mxu0  ;;  %v3619_v27 = vpop.f32.mrf.mxu1  ;;  %v1326_v53 = vadd.f32 1.0, %v2861_v28  ;;  %v3649_v51 = vmul.f32 %v1324_v33, %v3584_v58  ;;  %v1085_v33 = vmul.f32 0.70710677, %v611_v11 }
 0x16a   : > { %v2863_v32 = vpop.eup %2862 }
 0x16b   : > { %v3625_v36 = vpop.f32.mrf.mxu0  ;;  %v3627_v37 = vpop.f32.mrf.mxu1  ;;  %v1325_v52 = vadd.f32 1.0, %v2863_v32  ;;  %v3666_v21 = vmul.f32 %v1326_v53, %v3586_v59  ;;  %v1576_v46 = vpack.c.bf16 %v3649_v51, %v3629_v40  ;;  %v3678_v59 = vadd.f32 %v3580_v54, %v3548_v57 }
 0x16c   : > { %v2865_v39 = vpop.eup %2864  ;;  %v1087_v53 = vmul.f32 0.70710677, %v3663_v42  ;;  %2894 = verf.f32 %v1085_v33 }
 0x16d   : > { %v2867_v48 = vpop.eup %2866  ;;  %v3639_v41 = vpop.f32.mrf.mxu0  ;;  %v1327_v22 = vadd.f32 1.0, %v2865_v39  ;;  %v1453_v44 = vmul.f32 %v1325_v52, %v3589_v1  ;;  %v1578_v40 = vpack.c.bf16 %v3666_v21, %v3633_v38 }
 0x16e   : > { %v3641_v62 = vpop.f32.mrf.mxu1  ;;  %v2869_v4 = vpop.eup %2868  ;;  %v1328_v23 = vadd.f32 1.0, %v2867_v48  ;;  %2896 = verf.f32 %v1087_v53  ;;  %v3737_v53 = vmul.f32 0.5, %v611_v11 }
 0x16f   : > { %v2871_v50 = vpop.eup %2870  ;;  %v3655_v15 = vpop.f32.mrf.mxu0  ;;  %v1330_v29 = vadd.f32 1.0, %v2869_v4  ;;  %v3688_v4 = vadd.f32 %v3582_v55, %v3550_v60  ;;  %v1455_v0 = vmul.f32 %v1327_v22, %v3591_v2 }
 0x170   : > { %v3657_v18 = vpop.f32.mrf.mxu1  ;;  %v2873_v58 = vpop.eup %2872  ;;  %v1329_v30 = vadd.f32 1.0, %v2871_v50  ;;  %v3694_v54 = vmul.f32 %v1328_v23, %v3593_v3  ;;  %v3698_v50 = vadd.f32 %v3595_v5, %v3552_v61  ;;  %v3710_v3 = vmul.f32 0.5, %v802_v7 }
 0x171   : > { %v3670_v45 = vpop.f32.mrf.mxu0  ;;  %v2875_v32 = vpop.eup %2874  ;;  %v1331_v48 = vadd.f32 1.0, %v2873_v58  ;;  %v3705_v55 = vmul.f32 %v1330_v29, %v3599_v8  ;;  %v1088_v5 = vmul.f32 0.70710677, %v3678_v59  ;;  %v3715_v58 = vadd.f32 %v3597_v6, %v3554_v63 }
 0x172   : > { %v3672_v28 = vpop.f32.mrf.mxu1  ;;  %v2877_v10 = vpop.eup %2876  ;;  %v3708_v52 = vmul.f32 %v1329_v30, %v3602_v12  ;;  %v1332_v38 = vadd.f32 1.0, %v2875_v32  ;;  %v1090_v23 = vmul.f32 0.70710677, %v3688_v4  ;;  %v1577_v7 = vpack.c.bf16 %v1453_v44, %v3635_v49 }
 0x173   : > { %v3680_v35 = vpop.f32.mrf.mxu0  ;;  %v2879_v2 = vpop.eup %2878  ;;  %v3722_v12 = vmul.f32 %v1331_v48, %v3604_v13  ;;  %v1334_v30 = vadd.f32 1.0, %v2877_v10  ;;  %v1089_v31 = vmul.f32 0.70710677, %v3698_v50  ;;  %v619_v6 = vadd.f32 %v3608_v16, %v3548_v57 }
 0x174   : > { %v3682_v39 = vpop.f32.mrf.mxu1  ;;  %v2881_v8 = vpop.eup %2880  ;;  %v1579_v32 = vpack.c.bf16 %v1455_v0, %v3644_v47  ;;  %v3735_v13 = vmul.f32 %v1332_v38, %v3606_v14  ;;  %v1333_v48 = vadd.f32 1.0, %v2879_v2  ;;  %v3741_v49 = vadd.f32 %v3610_v17, %v3550_v60  ;;  %1935 = vmatprep.mubr.bf16.mxu0 %v1577_v7 }
 0x175   : > { %v3700_v1 = vpop.f32.mrf.mxu0  ;;  %v2883_v29 = vpop.eup %2882  ;;  %v1335_v10 = vadd.f32 1.0, %v2881_v8  ;;  %2898 = verf.f32 %v1088_v5  ;;  %v1091_v16 = vmul.f32 0.70710677, %v3715_v58  ;;  %v3746_v47 = vadd.f32 %v3617_v26, %v3552_v61  ;;  %1936 = vmatmul.mubr.bf16.vlgmr.msra.gmra.mxu0 %v1576_v46 }
 0x176   : > { %v3702_v51 = vpop.f32.mrf.mxu1  ;;  %v2885_v44 = vpop.eup %2884  ;;  %2096 = vmatprep.mubr.bf16.mxu1 %v1579_v32  ;;  %v1336_v0 = vadd.f32 1.0, %v2883_v29  ;;  %v3753_v17 = vmul.f32 0.5, %v3663_v42  ;;  %2900 = verf.f32 %v1090_v23  ;;  %v3757_v38 = vadd.f32 %v3619_v27, %v3554_v63 }
 0x177   : > { %v3717_v21 = vpop.f32.mrf.mxu0  ;;  %2097 = vmatmul.mubr.bf16.vlgmr.msra.gmra.mxu1 %v1578_v40  ;;  %v2887_v2 = vpop.eup %2886  ;;  %v3760_v26 = vmul.f32 %v1334_v30, %v3612_v20  ;;  %2902 = verf.f32 %v1089_v31  ;;  %v1092_v46 = vmul.f32 0.70710677, %v619_v6  ;;  %v3764_v5 = vadd.f32 %v3625_v36, %v3548_v57 }
 0x178   : > { %v3719_v22 = vpop.f32.mrf.mxu1  ;;  %v1461_v23 = vmul.f32 %v1333_v48, %v3615_v25  ;;  %v1338_v7 = vadd.f32 1.0, %v2885_v44  ;;  %v3772_v27 = vmul.f32 0.5, %v3678_v59  ;;  %v1094_v40 = vmul.f32 0.70710677, %v3741_v49  ;;  %v2889_v20 = vpop.eup %2888 }
 0x179   : > { %4850 = vst [vmem:[#allocation15_spill] sm:$0xff] %v3719_v22  ;;  %v3730_v33 = vpop.f32.mrf.mxu0  ;;  %v1463_v29 = vmul.f32 %v1335_v10, %v3622_v34  ;;  %v3777_v30 = vmul.f32 0.5, %v3688_v4  ;;  %2904 = verf.f32 %v1091_v16  ;;  %v1093_v36 = vmul.f32 0.70710677, %v3746_v47  ;;  %v2891_v25 = vpop.eup %2890 }
 0x17a   : > { %v3732_v22 = vpop.f32.mrf.mxu1  ;;  %v3785_v48 = vmul.f32 %v1336_v0, %v3631_v43  ;;  %v1337_v59 = vadd.f32 1.0, %v2887_v2  ;;  %v1095_v44 = vmul.f32 0.70710677, %v3757_v38  ;;  %v818_v34 = vadd.f32 %v3627_v37, %v3550_v60 }
 0x17b   : > { %v3748_v14 = vpop.f32.mrf.mxu0  ;;  %v3791_v4 = vmul.f32 0.5, %v3698_v50  ;;  %2906 = verf.f32 %v1092_v46  ;;  %v1096_v10 = vmul.f32 0.70710677, %v3764_v5  ;;  %v627_v16 = vadd.f32 %v3639_v41, %v3552_v61  ;;  %v2893_v50 = vpop.eup %2892 }
 0x17c   : > { %v3750_v11 = vpop.f32.mrf.mxu1  ;;  %v3801_v43 = vmul.f32 %v1338_v7, %v3637_v56  ;;  %v1339_v0 = vadd.f32 1.0, %v2889_v20  ;;  %2908 = verf.f32 %v1094_v40  ;;  %v3805_v37 = vadd.f32 %v3641_v62, %v3554_v63  ;;  %v2895_v56 = vpop.eup %2894 }
 0x17d   : > { %v3766_v8 = vpop.f32.mrf.mxu0  ;;  %v1340_v2 = vadd.f32 1.0, %v2891_v25  ;;  %v3808_v46 = vmul.f32 0.5, %v3715_v58  ;;  %2910 = verf.f32 %v1093_v36  ;;  %v3817_v7 = vmul.f32 %v1337_v59, %v3651_v9  ;;  %v2897_v20 = vpop.eup %2896 }
 0x17e   : > { %v3768_v42 = vpop.f32.mrf.mxu1  ;;  %2912 = verf.f32 %v1095_v44  ;;  %v1098_v40 = vmul.f32 0.70710677, %v818_v34  ;;  %v1581_v62 = vpack.c.bf16 %v1461_v23, %v3708_v52  ;;  %v1097_v25 = vmul.f32 0.70710677, %v627_v16 }
 0x17f   : > { %4851 = vst [vmem:[#allocation16_spill] sm:$0xff] %v3768_v42  ;;  %v3780_v31 = vpop.f32.mrf.mxu0  ;;  %v3810_v42 = vmul.f32 0.5, %v619_v6  ;;  %2914 = verf.f32 %v1096_v10  ;;  %v629_v58 = vadd.f32 %v3655_v15, %v3548_v57  ;;  %v1583_v6 = vpack.c.bf16 %v1463_v29, %v3722_v12 }
 0x180   : > { %4852 = vst [vmem:[#allocation17_spill] sm:$0xff] %v3780_v31  ;;  %v3782_v32 = vpop.f32.mrf.mxu1  ;;  %v3824_v36 = vmul.f32 %v1339_v0, %v3659_v19  ;;  %v1099_v9 = vmul.f32 0.70710677, %v3805_v37  ;;  %v822_v59 = vadd.f32 %v3657_v18, %v3550_v60  ;;  %1943 = vmatprep.mubr.bf16.mxu0 %v1581_v62  ;;  %v3833_v52 = vmul.f32 %v1340_v2, %v3668_v24 }
 0x181   : > { %4853 = vst [vmem:[#allocation18_spill] sm:$0xff] %v3782_v32  ;;  %v3796_v32 = vpop.f32.mrf.mxu0  ;;  %v1342_v23 = vadd.f32 1.0, %v2893_v50  ;;  %v3836_v15 = vmul.f32 0.5, %v3746_v47  ;;  %v631_v19 = vadd.f32 %v3670_v45, %v3552_v61  ;;  %2104 = vmatprep.mubr.bf16.mxu1 %v1583_v6  ;;  %v1341_v44 = vadd.f32 1.0, %v2895_v56 }
 0x182   : > { %v3798_v31 = vpop.f32.mrf.mxu1  ;;  %v2899_v29 = vpop.eup %2898  ;;  %v1343_v10 = vadd.f32 1.0, %v2897_v20  ;;  %v3845_v18 = vmul.f32 0.5, %v3757_v38  ;;  %2916 = verf.f32 %v1098_v40  ;;  %v1100_v0 = vmul.f32 0.70710677, %v629_v58 }
 0x183   : > { %4854 = vst [vmem:[#allocation19_spill] sm:$0xff] %v3798_v31  ;;  %v3812_v41 = vpop.f32.mrf.mxu0  ;;  %v2901_v24 = vpop.eup %2900  ;;  %2918 = verf.f32 %v1097_v25  ;;  %v824_v47 = vadd.f32 %v3672_v28, %v3554_v63  ;;  %v1580_v45 = vpack.c.bf16 %v3735_v13, %v3694_v54  ;;  %v1102_v2 = vmul.f32 0.70710677, %v822_v59 }
 0x184   : > { %v3814_v31 = vpop.f32.mrf.mxu1  ;;  %v2903_v50 = vpop.eup %2902  ;;  %2920 = verf.f32 %v1099_v9  ;;  %v635_v56 = vadd.f32 %v3680_v35, %v3548_v57  ;;  %v1582_v38 = vpack.c.bf16 %v3760_v26, %v3705_v55  ;;  %v3856_v40 = vmul.f32 %v1342_v23, %v3710_v3 }
 0x185   : > { %4855 = vst [vmem:[#allocation20_spill] sm:$0xff] %v3814_v31  ;;  %v3827_v31 = vmul.f32 0.5, %v3741_v49  ;;  %v3840_v12 = vpop.f32.mrf.mxu0  ;;  %v3859_v62 = vmul.f32 0.5, %v3764_v5  ;;  %v3861_v20 = vmul.f32 0.5, %v818_v34  ;;  %v1101_v28 = vmul.f32 0.70710677, %v631_v19  ;;  %1944 = vmatmul.mubr.bf16.gmra.mxu0 %v1580_v45 }
 0x186   : > { %v3842_v49 = vpop.f32.mrf.mxu1  ;;  %v2905_v25 = vpop.eup %2904  ;;  %v1469_v35 = vmul.f32 %v1341_v44, %v3737_v53  ;;  %v1344_v6 = vadd.f32 1.0, %v2899_v29  ;;  %v1346_v9 = vadd.f32 1.0, %v2901_v24  ;;  %v3868_v55 = vmul.f32 0.5, %v627_v16  ;;  %2105 = vmatmul.mubr.bf16.gmra.mxu1 %v1582_v38 }
 0x187   : > { %v3863_v54 = vpop.f32.mrf.mxu0  ;;  %v1345_v3 = vadd.f32 1.0, %v2903_v50  ;;  %2922 = verf.f32 %v1100_v0  ;;  %v1103_v26 = vmul.f32 0.70710677, %v824_v47  ;;  %v828_v5 = vadd.f32 %v3682_v39, %v3550_v60 }
 0x188   : > { %v3865_v13 = vpop.f32.mrf.mxu1  ;;  %v2907_v34 = vpop.eup %2906  ;;  %v1471_v23 = vmul.f32 %v1343_v10, %v3753_v17  ;;  %v3874_v45 = vmul.f32 0.5, %v3805_v37  ;;  %2924 = verf.f32 %v1102_v2  ;;  %v1347_v29 = vadd.f32 1.0, %v2905_v25 }
 0x189   : > { %4856 = vst [vmem:[#allocation21_spill] sm:$0xff] %v3865_v13  ;;  %v1104_v13 = vmul.f32 0.70710677, %v635_v56  ;;  %v2909_v53 = vpop.eup %2908  ;;  %v3876_v44 = vmul.f32 0.5, %v629_v58  ;;  %2926 = verf.f32 %v1101_v28  ;;  %v637_v16 = vadd.f32 %v3700_v1, %v3552_v61  ;;  %v3880_v24 = vpop.f32.mrf.mxu0 }
 0x18a   : > { %v3882_v0 = vpop.f32.mrf.mxu1  ;;  %v2911_v39 = vpop.eup %2910  ;;  %v3885_v17 = vmul.f32 %v1344_v6, %v3772_v27  ;;  %v3888_v37 = vmul.f32 %v1346_v9, %v3777_v30  ;;  %v3890_v10 = vmul.f32 0.5, %v822_v59  ;;  %v1585_v58 = vpack.c.bf16 %v1469_v35, %v3817_v7 }
 0x18b   : > { %4857 = vst [vmem:[#allocation22_spill] sm:$0xff] %v3882_v0  ;;  %v2913_v50 = vpop.eup %2912  ;;  %v3894_v2 = vmul.f32 %v1345_v3, %v3791_v4  ;;  %v3896_v1 = vmul.f32 0.5, %v631_v19  ;;  %2928 = verf.f32 %v1103_v26  ;;  %v1106_v38 = vmul.f32 0.70710677, %v828_v5  ;;  %v3907_v19 = vpop.f32.mrf.mxu0 }
 0x18c   : > { %v2915_v28 = vpop.eup %2914  ;;  %v1348_v25 = vadd.f32 1.0, %v2907_v34  ;;  %v3898_v0 = vmul.f32 0.5, %v824_v47  ;;  %2930 = verf.f32 %v1104_v13  ;;  %v830_v27 = vadd.f32 %v3702_v51, %v3554_v63  ;;  %1951 = vmatprep.mubr.bf16.mxu0 %v1585_v58  ;;  %v3909_v35 = vpop.f32.mrf.mxu1 }
 0x18d   : > { %v3903_v30 = vmul.f32 %v1347_v29, %v3808_v46  ;;  %v1350_v7 = vadd.f32 1.0, %v2909_v53  ;;  %v1105_v59 = vmul.f32 0.70710677, %v637_v16  ;;  %v639_v4 = vadd.f32 %v3717_v21, %v3548_v57  ;;  %v4858_v46 = vld [vmem:[#allocation15_spill] sm:$0xff] }
 0x18e   : > { %v1349_v6 = vadd.f32 1.0, %v2911_v39  ;;  %v1351_v47 = vadd.f32 1.0, %v2913_v50  ;;  %v3911_v9 = vmul.f32 0.5, %v635_v56  ;;  %v1587_v13 = vpack.c.bf16 %v1471_v23, %v3824_v36 }
 0x18f   : > { %v2917_v51 = vpop.eup %2916  ;;  %v1352_v3 = vadd.f32 1.0, %v2915_v28  ;;  %2932 = verf.f32 %v1106_v38  ;;  %v832_v26 = vadd.f32 %v4858_v46, %v3550_v60  ;;  %v1584_v34 = vpack.c.bf16 %v3833_v52, %v3785_v48  ;;  %v3929_v52 = vpop.f32.mrf.mxu0 }
 0x190   : > { %v2919_v21 = vpop.eup %2918  ;;  %v3919_v53 = vmul.f32 %v1348_v25, %v3810_v42  ;;  %v1107_v29 = vmul.f32 0.70710677, %v830_v27  ;;  %v641_v56 = vadd.f32 %v3730_v33, %v3552_v61  ;;  %2112 = vmatprep.mubr.bf16.mxu1 %v1587_v13  ;;  %v1586_v36 = vpack.c.bf16 %v3856_v40, %v3801_v43  ;;  %v3931_v42 = vpop.f32.mrf.mxu1 }
 0x191   : > { %v2921_v23 = vpop.eup %2920  ;;  %v3925_v39 = vmul.f32 0.5, %v828_v5  ;;  %2934 = verf.f32 %v1105_v59  ;;  %v1108_v58 = vmul.f32 0.70710677, %v639_v4  ;;  %v834_v48 = vadd.f32 %v3732_v22, %v3554_v63  ;;  %1952 = vmatmul.mubr.bf16.gmra.mxu0 %v1584_v34 }
 0x192   : > { %v3934_v50 = vmul.f32 %v1350_v7, %v3827_v31  ;;  %v1477_v33 = vmul.f32 %v1349_v6, %v3836_v15  ;;  %v1479_v43 = vmul.f32 %v1351_v47, %v3845_v18  ;;  %v1354_v40 = vadd.f32 1.0, %v2917_v51  ;;  %2113 = vmatmul.mubr.bf16.gmra.mxu1 %v1586_v36  ;;  %v3949_v6 = vpop.f32.mrf.mxu0 }
 0x193   : > { %v3939_v5 = vmul.f32 %v1352_v3, %v3859_v62  ;;  %v1353_v38 = vadd.f32 1.0, %v2919_v21  ;;  %v3941_v28 = vmul.f32 0.5, %v637_v16  ;;  %v1110_v22 = vmul.f32 0.70710677, %v832_v26  ;;  %v3951_v16 = vpop.f32.mrf.mxu1 }
 0x194   : > { %v2923_v25 = vpop.eup %2922  ;;  %v1355_v59 = vadd.f32 1.0, %v2921_v23  ;;  %2936 = verf.f32 %v1107_v29  ;;  %v1109_v13 = vmul.f32 0.70710677, %v641_v56  ;;  %v645_v31 = vadd.f32 %v3748_v14, %v3548_v57 }
 0x195   : > { %v2925_v7 = vpop.eup %2924  ;;  %v3945_v15 = vmul.f32 0.5, %v830_v27  ;;  %2938 = verf.f32 %v1108_v58  ;;  %v1111_v18 = vmul.f32 0.70710677, %v834_v48  ;;  %v838_v62 = vadd.f32 %v3750_v11, %v3550_v60  ;;  %v4859_v11 = vld [vmem:[#allocation16_spill] sm:$0xff]  ;;  %v3971_v58 = vpop.f32.mrf.mxu0 }
 0x196   : > { %v2927_v47 = vpop.eup %2926  ;;  %v3954_v51 = vmul.f32 %v1354_v40, %v3861_v20  ;;  %v3956_v3 = vmul.f32 0.5, %v639_v4  ;;  %v647_v14 = vadd.f32 %v3766_v8, %v3552_v61  ;;  %v1589_v27 = vpack.c.bf16 %v1477_v33, %v3894_v2  ;;  %v3973_v33 = vpop.f32.mrf.mxu1 }
 0x197   : > { %v3962_v46 = vmul.f32 %v1353_v38, %v3868_v55  ;;  %v1356_v34 = vadd.f32 1.0, %v2923_v25  ;;  %2940 = verf.f32 %v1110_v22  ;;  %v840_v21 = vadd.f32 %v4859_v11, %v3554_v63 }
 0x198   : > { %v2929_v29 = vpop.eup %2928  ;;  %v3967_v36 = vmul.f32 %v1355_v59, %v3874_v45  ;;  %v3969_v20 = vmul.f32 0.5, %v832_v26  ;;  %2942 = verf.f32 %v1109_v13  ;;  %v1112_v4 = vmul.f32 0.70710677, %v645_v31  ;;  %1959 = vmatprep.mubr.bf16.mxu0 %v1589_v27  ;;  %v4860_v59 = vld [vmem:[#allocation17_spill] sm:$0xff] }
 0x199   : > { %v2931_v8 = vpop.eup %2930  ;;  %v1358_v23 = vadd.f32 1.0, %v2925_v7  ;;  %v1357_v2 = vadd.f32 1.0, %v2927_v47  ;;  %2944 = verf.f32 %v1111_v18  ;;  %v1114_v55 = vmul.f32 0.70710677, %v838_v62 }
 0x19a   : > { %v3975_v40 = vmul.f32 0.5, %v641_v56  ;;  %v3977_v38 = vmul.f32 0.5, %v834_v48  ;;  %v1113_v45 = vmul.f32 0.70710677, %v647_v14  ;;  %v1591_v26 = vpack.c.bf16 %v1479_v43, %v3903_v30  ;;  %v4861_v56 = vld [vmem:[#allocation18_spill] sm:$0xff] }
 0x19b   : > { %v3981_v22 = vmul.f32 %v1356_v34, %v3876_v44  ;;  %v1115_v25 = vmul.f32 0.70710677, %v840_v21  ;;  %v649_v13 = vadd.f32 %v4860_v59, %v3548_v57  ;;  %v1588_v7 = vpack.c.bf16 %v3919_v53, %v3885_v17  ;;  %v3995_v34 = vpop.f32.mrf.mxu0  ;;  %v3997_v17 = vpop.f32.mrf.mxu1 }
 0x19c   : > { %v2933_v18 = vpop.eup %2932  ;;  %v1359_v47 = vadd.f32 1.0, %v2929_v29  ;;  %v1360_v27 = vadd.f32 1.0, %v2931_v8  ;;  %2946 = verf.f32 %v1112_v4  ;;  %v842_v48 = vadd.f32 %v4861_v56, %v3550_v60  ;;  %2120 = vmatprep.mubr.bf16.mxu1 %v1591_v26  ;;  %v4862_v29 = vld [vmem:[#allocation19_spill] sm:$0xff] }
 0x19d   : > { %v3990_v30 = vmul.f32 %v1358_v23, %v3890_v10  ;;  %v1485_v44 = vmul.f32 %v1357_v2, %v3896_v1  ;;  %2948 = verf.f32 %v1114_v55  ;;  %v651_v43 = vadd.f32 %v3796_v32, %v3552_v61  ;;  %1960 = vmatmul.mubr.bf16.gmra.mxu0 %v1588_v7  ;;  %v4019_v7 = vpop.f32.mrf.mxu0 }
 0x19e   : > { %v2935_v53 = vpop.eup %2934  ;;  %v3999_v11 = vmul.f32 0.5, %v645_v31  ;;  %2950 = verf.f32 %v1113_v45  ;;  %v844_v4 = vadd.f32 %v4862_v29, %v3554_v63  ;;  %v1590_v10 = vpack.c.bf16 %v3934_v50, %v3888_v37  ;;  %v4863_v50 = vld [vmem:[#allocation20_spill] sm:$0xff] }
 0x19f   : > { %v1362_v1 = vadd.f32 1.0, %v2933_v18  ;;  %2952 = verf.f32 %v1115_v25  ;;  %v1116_v8 = vmul.f32 0.70710677, %v649_v13  ;;  %v4007_v32 = vadd.f32 %v3812_v41, %v3548_v57  ;;  %v4021_v41 = vpop.f32.mrf.mxu1 }
 0x1a0   : > { %v1487_v23 = vmul.f32 %v1359_v47, %v3898_v0  ;;  %v4011_v2 = vmul.f32 %v1360_v27, %v3911_v9  ;;  %v4013_v31 = vmul.f32 0.5, %v838_v62  ;;  %v1118_v55 = vmul.f32 0.70710677, %v842_v48  ;;  %2121 = vmatmul.mubr.bf16.gmra.mxu1 %v1590_v10  ;;  %4864 = vst [vmem:[#allocation15_spill] sm:$0xff] %v4021_v41 }
 0x1a1   : > { %v2937_v45 = vpop.eup %2936  ;;  %v1361_v26 = vadd.f32 1.0, %v2935_v53  ;;  %v4015_v59 = vmul.f32 0.5, %v647_v14  ;;  %v1117_v37 = vmul.f32 0.70710677, %v651_v43  ;;  %v848_v25 = vadd.f32 %v4863_v50, %v3550_v60  ;;  %v4047_v50 = vpop.f32.mrf.mxu1 }
 0x1a2   : > { %v2939_v0 = vpop.eup %2938  ;;  %v4023_v18 = vmul.f32 0.5, %v840_v21  ;;  %v4025_v9 = vmul.f32 0.5, %v649_v13  ;;  %v1119_v62 = vmul.f32 0.70710677, %v844_v4  ;;  %v4029_v47 = vadd.f32 %v3840_v12, %v3552_v61  ;;  %4865 = vst [vmem:[#allocation16_spill] sm:$0xff] %v4047_v50 }
 0x1a3   : > { %v4032_v14 = vmul.f32 %v1362_v1, %v3925_v39  ;;  %2954 = verf.f32 %v1116_v8  ;;  %v1120_v27 = vmul.f32 0.70710677, %v4007_v32  ;;  %v4037_v56 = vadd.f32 %v3842_v49, %v3554_v63  ;;  %v4045_v8 = vpop.f32.mrf.mxu0 }
 0x1a4   : > { %v2941_v53 = vpop.eup %2940  ;;  %v1363_v21 = vadd.f32 1.0, %v2937_v45  ;;  %v4039_v29 = vmul.f32 0.5, %v842_v48  ;;  %2956 = verf.f32 %v1118_v55  ;;  %v1593_v13 = vpack.c.bf16 %v1485_v44, %v3962_v46  ;;  %v4866_v44 = vld [vmem:[#allocation21_spill] sm:$0xff] }
 0x1a5   : > { %v2943_v10 = vpop.eup %2942  ;;  %v4043_v12 = vmul.f32 %v1361_v26, %v3941_v28  ;;  %v1364_v39 = vadd.f32 1.0, %v2939_v0  ;;  %2958 = verf.f32 %v1117_v37  ;;  %v1122_v1 = vmul.f32 0.70710677, %v848_v25 }
 0x1a6   : > { %v2945_v49 = vpop.eup %2944  ;;  %v4049_v41 = vmul.f32 0.5, %v651_v43  ;;  %2960 = verf.f32 %v1119_v62  ;;  %v1121_v48 = vmul.f32 0.70710677, %v4029_v47  ;;  %v659_v46 = vadd.f32 %v3863_v54, %v3548_v57  ;;  %1967 = vmatprep.mubr.bf16.mxu0 %v1593_v13  ;;  %v4067_v13 = vpop.f32.mrf.mxu0 }
 0x1a7   : > { %2962 = verf.f32 %v1120_v27  ;;  %v1123_v28 = vmul.f32 0.70710677, %v4037_v56  ;;  %v852_v55 = vadd.f32 %v4866_v44, %v3550_v60  ;;  %v1595_v45 = vpack.c.bf16 %v1487_v23, %v3967_v36  ;;  %v4069_v36 = vpop.f32.mrf.mxu1 }
 0x1a8   : > { %v4059_v26 = vmul.f32 %v1363_v21, %v3945_v15  ;;  %v1366_v43 = vadd.f32 1.0, %v2941_v53  ;;  %v1365_v37 = vadd.f32 1.0, %v2943_v10  ;;  %v661_v0 = vadd.f32 %v3880_v24, %v3552_v61  ;;  %v4867_v24 = vld [vmem:[#allocation22_spill] sm:$0xff] }
 0x1a9   : > { %v2947_v62 = vpop.eup %2946  ;;  %v1367_v50 = vadd.f32 1.0, %v2945_v49  ;;  %2964 = verf.f32 %v1122_v1  ;;  %2128 = vmatprep.mubr.bf16.mxu1 %v1595_v45  ;;  %v1592_v54 = vpack.c.bf16 %v3981_v22, %v3939_v5  ;;  %v1594_v27 = vpack.c.bf16 %v3990_v30, %v3954_v51  ;;  %v4092_v45 = vpop.f32.mrf.mxu1 }
 0x1aa   : > { %v2949_v15 = vpop.eup %2948  ;;  %v4071_v23 = vmul.f32 0.5, %v844_v4  ;;  %2966 = verf.f32 %v1121_v48  ;;  %v1124_v53 = vmul.f32 0.70710677, %v659_v46  ;;  %v854_v21 = vadd.f32 %v4867_v24, %v3554_v63 }
 0x1ab   : > { %v2951_v10 = vpop.eup %2950  ;;  %v4076_v1 = vmul.f32 %v1364_v39, %v3956_v3  ;;  %v4079_v5 = vmul.f32 0.5, %v4007_v32  ;;  %2968 = verf.f32 %v1123_v28  ;;  %v1126_v51 = vmul.f32 0.70710677, %v852_v55  ;;  %1968 = vmatmul.mubr.bf16.gmra.mxu0 %v1592_v54  ;;  %2129 = vmatmul.mubr.bf16.gmra.mxu1 %v1594_v27  ;;  %v4090_v28 = vpop.f32.mrf.mxu0 }
 0x1ac   : > { %v2953_v22 = vpop.eup %2952  ;;  %v4082_v30 = vmul.f32 %v1366_v43, %v3969_v20  ;;  %v1368_v4 = vadd.f32 1.0, %v2947_v62  ;;  %v4084_v49 = vmul.f32 0.5, %v848_v25  ;;  %v1125_v48 = vmul.f32 0.70710677, %v661_v0 }
 0x1ad   : > { %v1493_v44 = vmul.f32 %v1365_v37, %v3975_v40  ;;  %v1495_v3 = vmul.f32 %v1367_v50, %v3977_v38  ;;  %v1370_v39 = vadd.f32 1.0, %v2949_v15  ;;  %v665_v32 = vadd.f32 %v3907_v19, %v3548_v57 }
 0x1ae   : > { %v1369_v54 = vadd.f32 1.0, %v2951_v10  ;;  %2970 = verf.f32 %v1124_v53  ;;  %v1127_v20 = vmul.f32 0.70710677, %v854_v21  ;;  %v4096_v25 = vadd.f32 %v3909_v35, %v3550_v60  ;;  %v4118_v53 = vpop.f32.mrf.mxu0 }
 0x1af   : > { %v1371_v43 = vadd.f32 1.0, %v2953_v22  ;;  %v4099_v40 = vmul.f32 0.5, %v4029_v47  ;;  %v4102_v38 = vmul.f32 0.5, %v4037_v56  ;;  %2972 = verf.f32 %v1126_v51 }
 0x1b0   : > { %v2955_v19 = vpop.eup %2954  ;;  %v4105_v50 = vmul.f32 %v1368_v4, %v3999_v11  ;;  %v4107_v37 = vmul.f32 0.5, %v659_v46  ;;  %2974 = verf.f32 %v1125_v48  ;;  %v667_v62 = vadd.f32 %v3929_v52, %v3552_v61  ;;  %v4120_v11 = vpop.f32.mrf.mxu1 }
 0x1b1   : > { %v2957_v35 = vpop.eup %2956  ;;  %v4112_v27 = vmul.f32 %v1370_v39, %v4013_v31  ;;  %v4114_v47 = vmul.f32 0.5, %v852_v55  ;;  %v1128_v15 = vmul.f32 0.70710677, %v665_v32  ;;  %v860_v56 = vadd.f32 %v3931_v42, %v3554_v63 }
 0x1b2   : > { %v2959_v46 = vpop.eup %2958  ;;  %v4123_v24 = vmul.f32 %v1369_v54, %v4015_v59  ;;  %v4125_v10 = vmul.f32 0.5, %v661_v0  ;;  %2976 = verf.f32 %v1127_v20  ;;  %v1130_v52 = vmul.f32 0.70710677, %v4096_v25 }
 0x1b3   : > { %v2961_v31 = vpop.eup %2960  ;;  %v4129_v55 = vmul.f32 %v1371_v43, %v4023_v18  ;;  %v1372_v51 = vadd.f32 1.0, %v2955_v19  ;;  %v4131_v22 = vmul.f32 0.5, %v854_v21  ;;  %v669_v42 = vadd.f32 %v3949_v6, %v3548_v57  ;;  %v4141_v21 = vpop.f32.mrf.mxu0 }
 0x1b4   : > { %v2963_v4 = vpop.eup %2962  ;;  %v1374_v48 = vadd.f32 1.0, %v2957_v35  ;;  %v1129_v39 = vmul.f32 0.70710677, %v667_v62  ;;  %v862_v59 = vadd.f32 %v3951_v16, %v3550_v60  ;;  %v1597_v0 = vpack.c.bf16 %v1493_v44, %v4043_v12  ;;  %v4143_v43 = vpop.f32.mrf.mxu1 }
 0x1b5   : > { %2978 = verf.f32 %v1128_v15  ;;  %v1131_v54 = vmul.f32 0.70710677, %v860_v56  ;;  %v671_v18 = vadd.f32 %v3971_v58, %v3552_v61  ;;  %v1599_v20 = vpack.c.bf16 %v1495_v3, %v4059_v26  ;;  %4868 = vst [vmem:[#allocation17_spill] sm:$0xff] %v4143_v43 }
 0x1b6   : > { %v2965_v6 = vpop.eup %2964  ;;  %v1373_v19 = vadd.f32 1.0, %v2959_v46  ;;  %v1375_v35 = vadd.f32 1.0, %v2961_v31  ;;  %2980 = verf.f32 %v1130_v52  ;;  %1975 = vmatprep.mubr.bf16.mxu0 %v1597_v0  ;;  %v1596_v16 = vpack.c.bf16 %v4076_v1, %v4011_v2  ;;  %v4159_v31 = vpop.f32.mrf.mxu0 }
 0x1b7   : > { %v2967_v12 = vpop.eup %2966  ;;  %v4148_v44 = vmul.f32 %v1372_v51, %v4025_v9  ;;  %v1376_v15 = vadd.f32 1.0, %v2963_v4  ;;  %v1132_v58 = vmul.f32 0.70710677, %v669_v42  ;;  %2136 = vmatprep.mubr.bf16.mxu1 %v1599_v20  ;;  %v1598_v26 = vpack.c.bf16 %v4082_v30, %v4032_v14  ;;  %v4161_v51 = vpop.f32.mrf.mxu1 }
 0x1b8   : > { %v2969_v3 = vpop.eup %2968  ;;  %v4153_v43 = vmul.f32 %v1374_v48, %v4039_v29  ;;  %v4155_v46 = vmul.f32 0.5, %v665_v32  ;;  %2982 = verf.f32 %v1129_v39  ;;  %v1134_v52 = vmul.f32 0.70710677, %v862_v59  ;;  %1976 = vmatmul.mubr.bf16.gmra.mxu0 %v1596_v16 }
 0x1b9   : > { %v1378_v2 = vadd.f32 1.0, %v2965_v6  ;;  %2984 = verf.f32 %v1131_v54  ;;  %v1133_v1 = vmul.f32 0.70710677, %v671_v18  ;;  %v864_v9 = vadd.f32 %v3973_v33, %v3554_v63  ;;  %2137 = vmatmul.mubr.bf16.gmra.mxu1 %v1598_v26  ;;  %v4184_v6 = vpop.f32.mrf.mxu0 }
 0x1ba   : > { %v1501_v14 = vmul.f32 %v1373_v19, %v4049_v41  ;;  %v1503_v29 = vmul.f32 %v1375_v35, %v4071_v23  ;;  %v1377_v30 = vadd.f32 1.0, %v2967_v12  ;;  %v4166_v32 = vmul.f32 0.5, %v4096_v25  ;;  %v4186_v19 = vpop.f32.mrf.mxu1 }
 0x1bb   : > { %v2971_v4 = vpop.eup %2970  ;;  %v4169_v48 = vmul.f32 %v1376_v15, %v4079_v5  ;;  %v1379_v39 = vadd.f32 1.0, %v2969_v3  ;;  %v4171_v0 = vmul.f32 0.5, %v667_v62  ;;  %2986 = verf.f32 %v1132_v58  ;;  %v4869_v3 = vld [vmem:[#allocation15_spill] sm:$0xff] }
 0x1bc   : > { %v2973_v33 = vpop.eup %2972  ;;  %v4173_v54 = vmul.f32 0.5, %v860_v56  ;;  %v4175_v20 = vmul.f32 0.5, %v669_v42  ;;  %2988 = verf.f32 %v1134_v52  ;;  %v675_v41 = vadd.f32 %v3995_v34, %v3548_v57 }
 0x1bd   : > { %v2975_v23 = vpop.eup %2974  ;;  %v4180_v25 = vmul.f32 %v1378_v2, %v4084_v49  ;;  %2990 = verf.f32 %v1133_v1  ;;  %v1135_v5 = vmul.f32 0.70710677, %v864_v9  ;;  %v868_v62 = vadd.f32 %v3997_v17, %v3550_v60  ;;  %v4208_v2 = vpop.f32.mrf.mxu0 }
 0x1be   : > { %v4189_v56 = vmul.f32 %v1377_v30, %v4099_v40  ;;  %v1380_v42 = vadd.f32 1.0, %v2971_v4  ;;  %v4191_v35 = vmul.f32 0.5, %v862_v59  ;;  %v677_v34 = vadd.f32 %v4019_v7, %v3552_v61  ;;  %v4870_v30 = vld [vmem:[#allocation16_spill] sm:$0xff] }
 0x1bf   : > { %v2977_v49 = vpop.eup %2976  ;;  %v4196_v16 = vmul.f32 %v1379_v39, %v4102_v38  ;;  %v1382_v12 = vadd.f32 1.0, %v2973_v33  ;;  %v4198_v15 = vmul.f32 0.5, %v671_v18  ;;  %v1601_v17 = vpack.c.bf16 %v1501_v14, %v4123_v24  ;;  %v4210_v18 = vpop.f32.mrf.mxu1 }
 0x1c0   : > { %v1381_v58 = vadd.f32 1.0, %v2975_v23  ;;  %v4201_v26 = vmul.f32 0.5, %v864_v9  ;;  %v1136_v40 = vmul.f32 0.70710677, %v675_v41  ;;  %v870_v59 = vadd.f32 %v4869_v3, %v3554_v63 }
 0x1c1   : > { %2992 = verf.f32 %v1135_v5  ;;  %v1138_v52 = vmul.f32 0.70710677, %v868_v62  ;;  %v679_v7 = vadd.f32 %v4045_v8, %v3548_v57  ;;  %1983 = vmatprep.mubr.bf16.mxu0 %v1601_v17  ;;  %v1603_v38 = vpack.c.bf16 %v1503_v29, %v4129_v55 }
 0x1c2   : > { %v2979_v24 = vpop.eup %2978  ;;  %v4213_v1 = vmul.f32 %v1380_v42, %v4107_v37  ;;  %v1383_v9 = vadd.f32 1.0, %v2977_v49  ;;  %v1137_v14 = vmul.f32 0.70710677, %v677_v34  ;;  %v872_v4 = vadd.f32 %v4870_v30, %v3550_v60 }
 0x1c3   : > { %v2981_v39 = vpop.eup %2980  ;;  %v4218_v33 = vmul.f32 %v1382_v12, %v4114_v47  ;;  %v681_v8 = vadd.f32 %v4067_v13, %v3552_v61  ;;  %2144 = vmatprep.mubr.bf16.mxu1 %v1603_v38  ;;  %v1600_v55 = vpack.c.bf16 %v4148_v44, %v4105_v50  ;;  %v1602_v37 = vpack.c.bf16 %v4153_v43, %v4112_v27  ;;  %v4231_v12 = vpop.f32.mrf.mxu0 }
 0x1c4   : > { %v1509_v29 = vmul.f32 %v1381_v58, %v4125_v10  ;;  %2994 = verf.f32 %v1136_v40  ;;  %v1139_v23 = vmul.f32 0.70710677, %v870_v59  ;;  %v874_v5 = vadd.f32 %v4069_v36, %v3554_v63  ;;  %v4233_v50 = vpop.f32.mrf.mxu1 }
 0x1c5   : > { %v2983_v42 = vpop.eup %2982  ;;  %v1384_v47 = vadd.f32 1.0, %v2979_v24  ;;  %v4229_v49 = vmul.f32 0.5, %v675_v41  ;;  %2996 = verf.f32 %v1138_v52  ;;  %v1140_v13 = vmul.f32 0.70710677, %v679_v7  ;;  %1984 = vmatmul.mubr.bf16.gmra.mxu0 %v1600_v55  ;;  %2145 = vmatmul.mubr.bf16.gmra.mxu1 %v1602_v37 }
 0x1c6   : > { %v2985_v27 = vpop.eup %2984  ;;  %v1511_v10 = vmul.f32 %v1383_v9, %v4131_v22  ;;  %v1386_v43 = vadd.f32 1.0, %v2981_v39  ;;  %2998 = verf.f32 %v1137_v14  ;;  %v1142_v44 = vmul.f32 0.70710677, %v872_v4 }
 0x1c7   : > { %v4236_v17 = vmul.f32 0.5, %v868_v62  ;;  %v4238_v36 = vmul.f32 0.5, %v677_v34  ;;  %v1141_v41 = vmul.f32 0.70710677, %v681_v8  ;;  %v685_v58 = vadd.f32 %v4090_v28, %v3548_v57  ;;  %v4249_v62 = vpop.f32.mrf.mxu0  ;;  %v4251_v34 = vpop.f32.mrf.mxu1 }
 0x1c8   : > { %v2987_v40 = vpop.eup %2986  ;;  %v1385_v3 = vadd.f32 1.0, %v2983_v42  ;;  %v4242_v52 = vmul.f32 0.5, %v870_v59  ;;  %3000 = verf.f32 %v1139_v23  ;;  %v1143_v38 = vmul.f32 0.70710677, %v874_v5 }
 0x1c9   : > { %v2989_v24 = vpop.eup %2988  ;;  %v4245_v22 = vmul.f32 %v1384_v47, %v4155_v46  ;;  %v1387_v9 = vadd.f32 1.0, %v2985_v27  ;;  %v4247_v14 = vmul.f32 0.5, %v679_v7  ;;  %3002 = verf.f32 %v1140_v13  ;;  %v4273_v13 = vpop.f32.mrf.mxu0 }
 0x1ca   : > { %v2991_v30 = vpop.eup %2990  ;;  %v4254_v28 = vmul.f32 %v1386_v43, %v4166_v32  ;;  %v4256_v59 = vmul.f32 0.5, %v872_v4  ;;  %3004 = verf.f32 %v1142_v44  ;;  %v878_v39 = vadd.f32 %v4092_v45, %v3550_v60  ;;  %v4275_v27 = vpop.f32.mrf.mxu1 }
 0x1cb   : > { %v1388_v46 = vadd.f32 1.0, %v2987_v40  ;;  %3006 = verf.f32 %v1141_v41  ;;  %v1144_v55 = vmul.f32 0.70710677, %v685_v58  ;;  %v687_v7 = vadd.f32 %v4118_v53, %v3552_v61 }
 0x1cc   : > { %v4263_v37 = vmul.f32 %v1385_v3, %v4171_v0  ;;  %3008 = verf.f32 %v1143_v38  ;;  %v880_v32 = vadd.f32 %v4120_v11, %v3554_v63  ;;  %v1605_v4 = vpack.c.bf16 %v1509_v29, %v4189_v56  ;;  %v4871_v29 = vld [vmem:[#allocation17_spill] sm:$0xff] }
 0x1cd   : > { %v4269_v23 = vmul.f32 %v1387_v9, %v4173_v54  ;;  %v1390_v42 = vadd.f32 1.0, %v2989_v24  ;;  %v1389_v45 = vadd.f32 1.0, %v2991_v30  ;;  %v4271_v47 = vmul.f32 0.5, %v681_v8  ;;  %v4305_v24 = vpop.f32.mrf.mxu1 }
 0x1ce   : > { %v2993_v53 = vpop.eup %2992  ;;  %v4277_v0 = vmul.f32 0.5, %v874_v5  ;;  %v1146_v43 = vmul.f32 0.70710677, %v878_v39  ;;  %v689_v11 = vadd.f32 %v4141_v21, %v3548_v57  ;;  %1991 = vmatprep.mubr.bf16.mxu0 %v1605_v4  ;;  %v1607_v56 = vpack.c.bf16 %v1511_v10, %v4196_v16 }
 0x1cf   : > { %v4283_v54 = vmul.f32 %v1388_v46, %v4175_v20  ;;  %3010 = verf.f32 %v1144_v55  ;;  %v1145_v8 = vmul.f32 0.70710677, %v687_v7  ;;  %v882_v44 = vadd.f32 %v4871_v29, %v3550_v60 }
 0x1d0   : > { %v1147_v41 = vmul.f32 0.70710677, %v880_v32  ;;  %v4289_v5 = vadd.f32 %v4159_v31, %v3552_v61  ;;  %2152 = vmatprep.mubr.bf16.mxu1 %v1607_v56  ;;  %v1604_v21 = vpack.c.bf16 %v4213_v1, %v4169_v48  ;;  %v1606_v16 = vpack.c.bf16 %v4218_v33, %v4180_v25  ;;  %v4303_v31 = vpop.f32.mrf.mxu0 }
 0x1d1   : > { %v2995_v10 = vpop.eup %2994  ;;  %v4296_v20 = vmul.f32 %v1390_v42, %v4191_v35  ;;  %v1517_v40 = vmul.f32 %v1389_v45, %v4198_v15  ;;  %v1391_v3 = vadd.f32 1.0, %v2993_v53  ;;  %v4301_v38 = vadd.f32 %v4161_v51, %v3554_v63 }
 0x1d2   : > { %v2997_v9 = vpop.eup %2996  ;;  %v4307_v48 = vmul.f32 0.5, %v685_v58  ;;  %3012 = verf.f32 %v1146_v43  ;;  %v1148_v25 = vmul.f32 0.70710677, %v689_v11  ;;  %v4311_v35 = vadd.f32 %v4184_v6, %v3548_v57  ;;  %1992 = vmatmul.mubr.bf16.gmra.mxu0 %v1604_v21  ;;  %2153 = vmatmul.mubr.bf16.gmra.mxu1 %v1606_v16  ;;  %v4328_v45 = vpop.f32.mrf.mxu0 }
 0x1d3   : > { %v2999_v15 = vpop.eup %2998  ;;  %v4313_v1 = vmul.f32 0.5, %v878_v39  ;;  %3014 = verf.f32 %v1145_v8  ;;  %v1150_v51 = vmul.f32 0.70710677, %v882_v44  ;;  %v4317_v33 = vadd.f32 %v4186_v19, %v3550_v60  ;;  %v4330_v19 = vpop.f32.mrf.mxu1 }
 0x1d4   : > { %v1392_v30 = vadd.f32 1.0, %v2995_v10  ;;  %3016 = verf.f32 %v1147_v41  ;;  %v1149_v58 = vmul.f32 0.70710677, %v4289_v5  ;;  %v4322_v46 = vadd.f32 %v4208_v2, %v3552_v61 }
 0x1d5   : > { %v3001_v6 = vpop.eup %3000  ;;  %v1519_v55 = vmul.f32 %v1391_v3, %v4201_v26  ;;  %v1394_v4 = vadd.f32 1.0, %v2997_v9  ;;  %v4325_v39 = vmul.f32 0.5, %v687_v7  ;;  %v1151_v42 = vmul.f32 0.70710677, %v4301_v38 }
 0x1d6   : > { %v3003_v53 = vpop.eup %3002  ;;  %v1393_v43 = vadd.f32 1.0, %v2999_v15  ;;  %v4332_v56 = vmul.f32 0.5, %v880_v32  ;;  %3018 = verf.f32 %v1148_v25  ;;  %v1152_v2 = vmul.f32 0.70710677, %v4311_v35  ;;  %v4354_v25 = vpop.f32.mrf.mxu1 }
 0x1d7   : > { %v3005_v8 = vpop.eup %3004  ;;  %v4335_v29 = vmul.f32 0.5, %v689_v11  ;;  %3020 = verf.f32 %v1150_v51  ;;  %v1154_v26 = vmul.f32 0.70710677, %v4317_v33  ;;  %v890_v7 = vadd.f32 %v4210_v18, %v3554_v63  ;;  %v4352_v18 = vpop.f32.mrf.mxu0 }
 0x1d8   : > { %v3007_v41 = vpop.eup %3006  ;;  %v4341_v21 = vmul.f32 %v1392_v30, %v4229_v49  ;;  %v4343_v16 = vmul.f32 0.5, %v882_v44  ;;  %3022 = verf.f32 %v1149_v58  ;;  %v1153_v32 = vmul.f32 0.70710677, %v4322_v46 }
 0x1d9   : > { %v3009_v10 = vpop.eup %3008  ;;  %v4347_v3 = vmul.f32 %v1394_v4, %v4236_v17  ;;  %3024 = verf.f32 %v1151_v42  ;;  %v699_v11 = vadd.f32 %v4231_v12, %v3548_v57  ;;  %v1609_v9 = vpack.c.bf16 %v1517_v40, %v4263_v37 }
 0x1da   : > { %v4357_v49 = vmul.f32 %v1393_v43, %v4238_v36  ;;  %v1395_v44 = vadd.f32 1.0, %v3001_v6  ;;  %v1396_v15 = vadd.f32 1.0, %v3003_v53  ;;  %3026 = verf.f32 %v1152_v2 }
 0x1db   : > { %v1398_v51 = vadd.f32 1.0, %v3005_v8  ;;  %3028 = verf.f32 %v1154_v26  ;;  %v1155_v17 = vmul.f32 0.70710677, %v890_v7  ;;  %1999 = vmatprep.mubr.bf16.mxu0 %v1609_v9  ;;  %v1611_v30 = vpack.c.bf16 %v1519_v55, %v4269_v23  ;;  %v4370_v23 = vpop.f32.mrf.mxu0  ;;  %v4372_v55 = vpop.f32.mrf.mxu1 }
 0x1dc   : > { %v3011_v58 = vpop.eup %3010  ;;  %v1397_v12 = vadd.f32 1.0, %v3007_v41  ;;  %v1399_v4 = vadd.f32 1.0, %v3009_v10  ;;  %3030 = verf.f32 %v1153_v32  ;;  %v892_v37 = vadd.f32 %v4233_v50, %v3550_v60 }
 0x1dd   : > { %v1156_v40 = vmul.f32 0.70710677, %v699_v11  ;;  %v4364_v36 = vadd.f32 %v4249_v62, %v3552_v61  ;;  %2160 = vmatprep.mubr.bf16.mxu1 %v1611_v30  ;;  %v1608_v6 = vpack.c.bf16 %v4283_v54, %v4245_v22  ;;  %v1610_v42 = vpack.c.bf16 %v4296_v20, %v4254_v28  ;;  %v4406_v26 = vpop.f32.mrf.mxu0  ;;  %v4408_v41 = vpop.f32.mrf.mxu1 }
 0x1de   : > { %v4375_v53 = vmul.f32 %v1395_v44, %v4242_v52  ;;  %v4378_v50 = vmul.f32 %v1396_v15, %v4247_v14  ;;  %v4381_v62 = vmul.f32 0.5, %v4289_v5  ;;  %v4385_v43 = vadd.f32 %v4251_v34, %v3554_v63 }
 0x1df   : > { %v3013_v22 = vpop.eup %3012  ;;  %v4388_v28 = vmul.f32 %v1398_v51, %v4256_v59  ;;  %v4391_v54 = vmul.f32 0.5, %v4301_v38  ;;  %v4394_v52 = vmul.f32 0.5, %v4311_v35  ;;  %3032 = verf.f32 %v1155_v17  ;;  %2000 = vmatmul.mubr.bf16.gmra.mxu0 %v1608_v6  ;;  %2161 = vmatmul.mubr.bf16.gmra.mxu1 %v1610_v42 }
 0x1e0   : > { %v3015_v14 = vpop.eup %3014  ;;  %v1525_v5 = vmul.f32 %v1397_v12, %v4271_v47  ;;  %v1400_v20 = vadd.f32 1.0, %v3011_v58  ;;  %v4398_v34 = vmul.f32 0.5, %v4317_v33  ;;  %v1158_v2 = vmul.f32 0.70710677, %v892_v37 }
 0x1e1   : > { %v3017_v8 = vpop.eup %3016  ;;  %v1527_v59 = vmul.f32 %v1399_v4, %v4277_v0  ;;  %3034 = verf.f32 %v1156_v40  ;;  %v1157_v38 = vmul.f32 0.70710677, %v4364_v36  ;;  %v4404_v35 = vadd.f32 %v4273_v13, %v3548_v57 }
 0x1e2   : > { %v1402_v47 = vadd.f32 1.0, %v3013_v22  ;;  %v4411_v32 = vmul.f32 0.5, %v4322_v46  ;;  %v1159_v33 = vmul.f32 0.70710677, %v4385_v43  ;;  %v4416_v0 = vadd.f32 %v4275_v27, %v3550_v60 }
 0x1e3   : > { %v3019_v10 = vpop.eup %3018  ;;  %v1401_v9 = vadd.f32 1.0, %v3015_v14  ;;  %v4418_v44 = vmul.f32 0.5, %v890_v7  ;;  %v4420_v13 = vmul.f32 0.5, %v699_v11  ;;  %v4424_v15 = vadd.f32 %v4303_v31, %v3552_v61  ;;  %v4440_v11 = vpop.f32.mrf.mxu0 }
 0x1e4   : > { %v3021_v51 = vpop.eup %3020  ;;  %v4427_v46 = vmul.f32 %v1400_v20, %v4307_v48  ;;  %v1403_v17 = vadd.f32 1.0, %v3017_v8  ;;  %3036 = verf.f32 %v1158_v2  ;;  %v4431_v27 = vadd.f32 %v4328_v45, %v3548_v57  ;;  %v4442_v48 = vpop.f32.mrf.mxu1 }
 0x1e5   : > { %v3023_v30 = vpop.eup %3022  ;;  %v4433_v58 = vmul.f32 0.5, %v892_v37  ;;  %3038 = verf.f32 %v1157_v38  ;;  %v1160_v7 = vmul.f32 0.70710677, %v4404_v35  ;;  %v4438_v31 = vadd.f32 %v4330_v19, %v3550_v60 }
 0x1e6   : > { %v3025_v12 = vpop.eup %3024  ;;  %v4445_v4 = vmul.f32 %v1402_v47, %v4313_v1  ;;  %3040 = verf.f32 %v1159_v33  ;;  %v1162_v45 = vmul.f32 0.70710677, %v4416_v0  ;;  %v1613_v37 = vpack.c.bf16 %v1525_v5, %v4357_v49  ;;  %v720_v47 = vpop.f32.mrf.mxu0 }
 0x1e7   : > { %v3027_v40 = vpop.eup %3026  ;;  %v4450_v6 = vmul.f32 %v1401_v9, %v4325_v39  ;;  %v1404_v42 = vadd.f32 1.0, %v3019_v10  ;;  %v1406_v19 = vadd.f32 1.0, %v3021_v51  ;;  %v1161_v22 = vmul.f32 0.70710677, %v4424_v15  ;;  %v913_v33 = vpop.f32.mrf.mxu1 }
 0x1e8   : > { %v3029_v14 = vpop.eup %3028  ;;  %v4454_v20 = vmul.f32 %v1403_v17, %v4332_v56  ;;  %v900_v1 = vadd.f32 %v4305_v24, %v3554_v63  ;;  %v1164_v2 = vmul.f32 0.70710677, %v4431_v27  ;;  %2007 = vmatprep.mubr.bf16.mxu0 %v1613_v37  ;;  %v1615_v49 = vpack.c.bf16 %v1527_v59, %v4375_v53 }
 0x1e9   : > { %v3031_v5 = vpop.eup %3030  ;;  %v1405_v8 = vadd.f32 1.0, %v3023_v30  ;;  %v4461_v39 = vmul.f32 0.5, %v4364_v36  ;;  %3042 = verf.f32 %v1160_v7  ;;  %v1166_v38 = vmul.f32 0.70710677, %v4438_v31 }
 0x1ea   : > { %v1407_v56 = vadd.f32 1.0, %v3025_v12  ;;  %3044 = verf.f32 %v1162_v45  ;;  %2168 = vmatprep.mubr.bf16.mxu1 %v1615_v49  ;;  %v1612_v24 = vpack.c.bf16 %v4378_v50, %v4341_v21  ;;  %v1614_v10 = vpack.c.bf16 %v4388_v28, %v4347_v3 }
 0x1eb   : > { %v4469_v53 = vmul.f32 %v1404_v42, %v4335_v29  ;;  %v4472_v36 = vmul.f32 %v1406_v19, %v4343_v16  ;;  %v4475_v59 = vmul.f32 0.5, %v4385_v43  ;;  %3046 = verf.f32 %v1161_v22  ;;  %v4482_v16 = vpop.f32.mrf.mxu0  ;;  %v4484_v43 = vpop.f32.mrf.mxu1 }
 0x1ec   : > { %v3033_v9 = vpop.eup %3032  ;;  %v1408_v51 = vadd.f32 1.0, %v3027_v40  ;;  %v1163_v17 = vmul.f32 0.70710677, %v900_v1  ;;  %3048 = verf.f32 %v1164_v2  ;;  %v711_v21 = vadd.f32 %v4352_v18, %v3552_v61  ;;  %2008 = vmatmul.mubr.bf16.gmra.mxu0 %v1612_v24  ;;  %2169 = vmatmul.mubr.bf16.gmra.mxu1 %v1614_v10 }
 0x1ed   : > { %v1410_v3 = vadd.f32 1.0, %v3029_v14  ;;  %v1409_v50 = vadd.f32 1.0, %v3031_v5  ;;  %v4480_v29 = vmul.f32 0.5, %v4404_v35  ;;  %3050 = verf.f32 %v1166_v38  ;;  %v919_v14 = vpop.f32.mrf.mxu1 }
 0x1ee   : > { %v3035_v28 = vpop.eup %3034  ;;  %v1533_v30 = vmul.f32 %v1405_v8, %v4381_v62  ;;  %v1535_v7 = vmul.f32 %v1407_v56, %v4391_v54  ;;  %v4489_v12 = vmul.f32 0.5, %v4416_v0  ;;  %v904_v18 = vadd.f32 %v4354_v25, %v3554_v63 }
 0x1ef   : > { %v1411_v45 = vadd.f32 1.0, %v3033_v9  ;;  %v4494_v35 = vmul.f32 0.5, %v4424_v15  ;;  %v4496_v37 = vmul.f32 0.5, %v900_v1  ;;  %v4500_v40 = vadd.f32 %v4370_v23, %v3548_v57  ;;  %v726_v23 = vpop.f32.mrf.mxu0 }
 0x1f0   : > { %v4503_v62 = vmul.f32 %v1408_v51, %v4394_v52  ;;  %3052 = verf.f32 %v1163_v17  ;;  %v4506_v54 = vmul.f32 0.5, %v4431_v27  ;;  %v1165_v0 = vmul.f32 0.70710677, %v711_v21 }
 0x1f1   : > { %v3037_v42 = vpop.eup %3036  ;;  %v4509_v25 = vmul.f32 %v1410_v3, %v4398_v34  ;;  %v4512_v15 = vmul.f32 %v1409_v50, %v4411_v32  ;;  %v1412_v19 = vadd.f32 1.0, %v3035_v28  ;;  %v4515_v22 = vmul.f32 0.5, %v4438_v31  ;;  %v728_v10 = vpop.f32.mrf.mxu0 }
 0x1f2   : > { %v3039_v52 = vpop.eup %3038  ;;  %v1167_v1 = vmul.f32 0.70710677, %v904_v18  ;;  %v717_v27 = vadd.f32 %v4406_v26, %v3552_v61  ;;  %v4520_v2 = vadd.f32 %v720_v47, %v3552_v61  ;;  %v4523_v34 = vadd.f32 %v913_v33, %v3554_v63 }
 0x1f3   : > { %v3041_v49 = vpop.eup %3040  ;;  %v4526_v32 = vmul.f32 %v1411_v45, %v4418_v44  ;;  %v1168_v31 = vmul.f32 0.70710677, %v4500_v40  ;;  %v910_v5 = vadd.f32 %v4408_v41, %v3554_v63  ;;  %v1617_v8 = vpack.c.bf16 %v1533_v30, %v4450_v6  ;;  %v921_v41 = vpop.f32.mrf.mxu1 }
 0x1f4   : > { %v1414_v38 = vadd.f32 1.0, %v3037_v42  ;;  %3054 = verf.f32 %v1165_v0  ;;  %v4534_v26 = vadd.f32 %v4372_v55, %v3550_v60  ;;  %v1173_v47 = vmul.f32 0.70710677, %v4520_v2 }
 0x1f5   : > { %v1413_v33 = vadd.f32 1.0, %v3039_v52  ;;  %v4537_v56 = vmul.f32 0.5, %v711_v21  ;;  %v1175_v44 = vmul.f32 0.70710677, %v4523_v34  ;;  %2015 = vmatprep.mubr.bf16.mxu0 %v1617_v8  ;;  %v1619_v24 = vpack.c.bf16 %v1535_v7, %v4454_v20 }
 0x1f6   : > { %v3043_v9 = vpop.eup %3042  ;;  %v1415_v6 = vadd.f32 1.0, %v3041_v49  ;;  %3056 = verf.f32 %v1167_v1  ;;  %v1169_v51 = vmul.f32 0.70710677, %v717_v27  ;;  %v719_v55 = vadd.f32 %v4440_v11, %v3548_v57 }
 0x1f7   : > { %v3045_v17 = vpop.eup %3044  ;;  %3058 = verf.f32 %v1168_v31  ;;  %v1171_v3 = vmul.f32 0.70710677, %v910_v5  ;;  %v912_v21 = vadd.f32 %v4442_v48, %v3550_v60  ;;  %2176 = vmatprep.mubr.bf16.mxu1 %v1619_v24  ;;  %v1616_v50 = vpack.c.bf16 %v4469_v53, %v4427_v46  ;;  %v730_v48 = vpop.f32.mrf.mxu0 }
 0x1f8   : > { %v3047_v20 = vpop.eup %3046  ;;  %v4548_v28 = vmul.f32 %v1412_v19, %v4420_v13  ;;  %v4550_v30 = vmul.f32 0.5, %v904_v18  ;;  %v1170_v7 = vmul.f32 0.70710677, %v4534_v26  ;;  %3060 = verf.f32 %v1173_v47  ;;  %v923_v13 = vpop.f32.mrf.mxu1 }
 0x1f9   : > { %v3049_v11 = vpop.eup %3048  ;;  %v4554_v45 = vmul.f32 %v1414_v38, %v4433_v58  ;;  %v4557_v0 = vmul.f32 %v1413_v33, %v4461_v39  ;;  %3062 = verf.f32 %v1175_v44  ;;  %2016 = vmatmul.mubr.bf16.gmra.mxu0 %v1616_v50  ;;  %v1618_v46 = vpack.c.bf16 %v4472_v36, %v4445_v4  ;;  %v4574_v47 = vpop.f32.mrf.mxu0 }
 0x1fa   : > { %v3051_v53 = vpop.eup %3050  ;;  %v1416_v18 = vadd.f32 1.0, %v3043_v9  ;;  %3064 = verf.f32 %v1169_v51  ;;  %v1172_v42 = vmul.f32 0.70710677, %v719_v55  ;;  %v4562_v19 = vadd.f32 %v726_v23, %v3552_v61 }
 0x1fb   : > { %v1543_v58 = vmul.f32 %v1415_v6, %v4475_v59  ;;  %3066 = verf.f32 %v1171_v3  ;;  %v1174_v52 = vmul.f32 0.70710677, %v912_v21  ;;  %2177 = vmatmul.mubr.bf16.gmra.mxu1 %v1618_v46  ;;  %v4566_v39 = vadd.f32 %v919_v14, %v3554_v63  ;;  %v4576_v59 = vpop.f32.mrf.mxu1 }
 0x1fc   : > { %v1418_v1 = vadd.f32 1.0, %v3045_v17  ;;  %3068 = verf.f32 %v1170_v7  ;;  %v4568_v4 = vmul.f32 0.5, %v717_v27  ;;  %v4570_v36 = vmul.f32 0.5, %v910_v5 }
 0x1fd   : > { %v3053_v49 = vpop.eup %3052  ;;  %v1417_v31 = vadd.f32 1.0, %v3047_v20  ;;  %v1420_v8 = vadd.f32 1.0, %v3049_v11  ;;  %v1422_v38 = vadd.f32 1.0, %v3051_v53  ;;  %v4572_v23 = vmul.f32 0.5, %v719_v55  ;;  %v929_v50 = vpop.f32.mrf.mxu1 }
 0x1fe   : > { %v4579_v33 = vmul.f32 %v1416_v18, %v4480_v29  ;;  %3070 = verf.f32 %v1172_v42  ;;  %v4581_v14 = vmul.f32 0.5, %v912_v21  ;;  %v1177_v27 = vmul.f32 0.70710677, %v4562_v19  ;;  %v736_v21 = vpop.f32.mrf.mxu0 }
 0x1ff   : > { %3072 = verf.f32 %v1174_v52  ;;  %v4586_v5 = vadd.f32 %v4482_v16, %v3548_v57  ;;  %v1179_v44 = vmul.f32 0.70710677, %v4566_v39  ;;  %v4590_v24 = vadd.f32 %v730_v48, %v3552_v61 }
 0x200   : > { %v4593_v9 = vmul.f32 %v1418_v1, %v4489_v12  ;;  %v1419_v29 = vadd.f32 1.0, %v3053_v49  ;;  %v4596_v6 = vadd.f32 %v728_v10, %v3548_v57  ;;  %v4599_v51 = vadd.f32 %v923_v13, %v3554_v63 }
 0x201   : > { %v3055_v55 = vpop.eup %3054  ;;  %v4602_v17 = vmul.f32 %v1417_v31, %v4494_v35  ;;  %v4605_v16 = vmul.f32 %v1420_v8, %v4506_v54  ;;  %v4608_v3 = vmul.f32 %v1422_v38, %v4515_v22  ;;  %v4611_v12 = vadd.f32 %v921_v41, %v3550_v60 }
 0x202   : > { %v4615_v10 = vadd.f32 %v4484_v43, %v3550_v60  ;;  %3074 = verf.f32 %v1177_v27  ;;  %v1181_v20 = vmul.f32 0.70710677, %v4590_v24  ;;  %v1183_v35 = vmul.f32 0.70710677, %v4599_v51 }
 0x203   : > { %v3057_v7 = vpop.eup %3056  ;;  %v1176_v54 = vmul.f32 0.70710677, %v4586_v5  ;;  %3076 = verf.f32 %v1179_v44  ;;  %v1621_v22 = vpack.c.bf16 %v4557_v0, %v4512_v15  ;;  %v1623_v41 = vpack.c.bf16 %v1543_v58, %v4526_v32  ;;  %v738_v15 = vpop.f32.mrf.mxu0 }
 0x204   : > { %v3059_v11 = vpop.eup %3058  ;;  %v4624_v46 = vmul.f32 %v1419_v29, %v4496_v37  ;;  %v1421_v43 = vadd.f32 1.0, %v3055_v55  ;;  %v1180_v48 = vmul.f32 0.70710677, %v4596_v6  ;;  %3078 = verf.f32 %v1181_v20  ;;  %v931_v32 = vpop.f32.mrf.mxu1 }
 0x205   : > { %v3061_v13 = vpop.eup %3060  ;;  %v1045_v53 = vmul.f32 0.5, %v4520_v2  ;;  %v1047_v18 = vmul.f32 0.5, %v4523_v34  ;;  %v1182_v42 = vmul.f32 0.70710677, %v4611_v12  ;;  %3080 = verf.f32 %v1183_v35  ;;  %2023 = vmatprep.mubr.bf16.mxu0 %v1621_v22  ;;  %2184 = vmatprep.mubr.bf16.mxu1 %v1623_v41 }
 0x206   : > { %v3063_v0 = vpop.eup %3062  ;;  %v1624_v37 = vpack.c.bf16 %v4605_v16, %v4579_v33  ;;  %v1626_v58 = vpack.c.bf16 %v4608_v3, %v4593_v9  ;;  %v1423_v52 = vadd.f32 1.0, %v3057_v7  ;;  %v1178_v1 = vmul.f32 0.70710677, %v4615_v10 }
 0x207   : > { %v3065_v2 = vpop.eup %3064  ;;  %3082 = verf.f32 %v1176_v54  ;;  %v1620_v34 = vpack.c.bf16 %v4548_v28, %v4503_v62  ;;  %v1622_v49 = vpack.c.bf16 %v4554_v45, %v4509_v25  ;;  %v4640_v31 = vadd.f32 %v736_v21, %v3552_v61  ;;  %v740_v25 = vpop.f32.mrf.mxu0 }
 0x208   : > { %v3067_v8 = vpop.eup %3066  ;;  %v1549_v38 = vmul.f32 %v1421_v43, %v4537_v56  ;;  %3084 = verf.f32 %v1180_v48  ;;  %v4644_v27 = vadd.f32 %v929_v50, %v3554_v63  ;;  %v4647_v44 = vadd.f32 %v738_v15, %v3548_v57  ;;  %v933_v28 = vpop.f32.mrf.mxu1 }
 0x209   : > { %v3069_v29 = vpop.eup %3068  ;;  %v1429_v55 = vadd.f32 1.0, %v3061_v13  ;;  %v1431_v20 = vadd.f32 1.0, %v3063_v0  ;;  %3086 = verf.f32 %v1182_v42  ;;  %2024 = vmatmul.mubr.bf16.gmra.mxu0 %v1620_v34  ;;  %2185 = vmatmul.mubr.bf16.gmra.mxu1 %v1622_v49  ;;  %v1185_v62 = vmul.f32 0.70710677, %v4640_v31 }
 0x20a   : > { %v1551_v45 = vmul.f32 %v1423_v52, %v4550_v30  ;;  %v1425_v56 = vadd.f32 1.0, %v3065_v2  ;;  %3088 = verf.f32 %v1178_v1  ;;  %v1187_v21 = vmul.f32 0.70710677, %v4644_v27 }
 0x20b   : > { %v3071_v50 = vpop.eup %3070  ;;  %v1427_v35 = vadd.f32 1.0, %v3067_v8  ;;  %v4654_v7 = vadd.f32 %v4574_v47, %v3548_v57  ;;  %v1188_v54 = vmul.f32 0.70710677, %v4647_v44  ;;  %v4658_v22 = vadd.f32 %v931_v32, %v3550_v60 }
 0x20c   : > { %v3073_v41 = vpop.eup %3072  ;;  %v4662_v43 = vadd.f32 %v4576_v59, %v3550_v60  ;;  %3090 = verf.f32 %v1185_v62  ;;  %v4665_v30 = vadd.f32 %v740_v25, %v3552_v61  ;;  %v4668_v48 = vadd.f32 %v933_v28, %v3554_v63 }
 0x20d   : > { %v1424_v13 = vadd.f32 1.0, %v3059_v11  ;;  %v1557_v57 = vmul.f32 %v1429_v55, %v1045_v53  ;;  %v1559_v47 = vmul.f32 %v1431_v20, %v1047_v18  ;;  %v1190_v42 = vmul.f32 0.70710677, %v4658_v22 }
 0x20e   : > { %v1553_v15 = vmul.f32 %v1425_v56, %v4568_v4  ;;  %v1428_v32 = vadd.f32 1.0, %v3071_v50  ;;  %3092 = verf.f32 %v1187_v21  ;;  %v1189_v0 = vmul.f32 0.70710677, %v4665_v30 }
 0x20f   : > { %v3075_v60 = vpop.eup %3074  ;;  %v1555_v59 = vmul.f32 %v1427_v35, %v4570_v36  ;;  %v1430_v52 = vadd.f32 1.0, %v3073_v41  ;;  %v1184_v61 = vmul.f32 0.70710677, %v4654_v7  ;;  %3094 = verf.f32 %v1188_v54 }
 0x210   : > { %v3077_v63 = vpop.eup %3076  ;;  %v1186_v11 = vmul.f32 0.70710677, %v4662_v43  ;;  %3096 = verf.f32 %v1189_v0  ;;  %v1191_v53 = vmul.f32 0.70710677, %v4668_v48  ;;  %v1625_v18 = vpack.c.bf16 %v1549_v38, %v4602_v17 }
 0x211   : > { %v3079_v4 = vpop.eup %3078  ;;  %3098 = verf.f32 %v1190_v42  ;;  %v1627_v1 = vpack.c.bf16 %v1551_v45, %v4624_v46  ;;  %v1629_v2 = vpack.c.bf16 %v1557_v57, %v1553_v15  ;;  %v1631_v34 = vpack.c.bf16 %v1559_v47, %v1555_v59 }
 0x212   : > { %v3081_v49 = vpop.eup %3080  ;;  %v1433_v36 = vadd.f32 1.0, %v3075_v60  ;;  %v1053_v8 = vmul.f32 0.5, %v4590_v24  ;;  %v1437_v55 = vadd.f32 1.0, %v3079_v4  ;;  %3100 = verf.f32 %v1191_v53  ;;  %2031 = vmatprep.mubr.bf16.mxu0 %v1625_v18 }
 0x213   : > { %v1435_v20 = vadd.f32 1.0, %v3077_v63  ;;  %v1055_v62 = vmul.f32 0.5, %v4599_v51  ;;  %v1439_v25 = vadd.f32 1.0, %v3081_v49  ;;  %3102 = verf.f32 %v1184_v61  ;;  %2192 = vmatprep.mubr.bf16.mxu1 %v1627_v1  ;;  %2032 = vmatmul.mubr.bf16.gmra.mxu0 %v1624_v37 }
 0x214   : > { %v3083_v17 = vpop.eup %3082  ;;  %v1426_v46 = vadd.f32 1.0, %v3069_v29  ;;  %v1049_v38 = vmul.f32 0.5, %v4562_v19  ;;  %v1565_v28 = vmul.f32 %v1437_v55, %v1053_v8  ;;  %3104 = verf.f32 %v1186_v11  ;;  %2193 = vmatmul.mubr.bf16.gmra.mxu1 %v1626_v58  ;;  %2039 = vmatprep.mubr.bf16.mxu0 %v1629_v2 }
 0x215   : > { %v3085_v24 = vpop.eup %3084  ;;  %v1040_v51 = vmul.f32 0.5, %v4500_v40  ;;  %v1556_v45 = vmul.f32 %v1428_v32, %v4572_v23  ;;  %v1051_v56 = vmul.f32 0.5, %v4566_v39  ;;  %v1567_v33 = vmul.f32 %v1439_v25, %v1055_v62  ;;  %2200 = vmatprep.mubr.bf16.mxu1 %v1631_v34 }
 0x216   : > { %v3087_v16 = vpop.eup %3086  ;;  %v1042_v37 = vmul.f32 0.5, %v4534_v26  ;;  %v1558_v19 = vmul.f32 %v1430_v52, %v4581_v14  ;;  %v1561_v29 = vmul.f32 %v1433_v36, %v1049_v38  ;;  %v1436_v40 = vadd.f32 1.0, %v3085_v24 }
 0x217   : > { %v3089_v21 = vpop.eup %3088  ;;  %v1552_v50 = vmul.f32 %v1424_v13, %v1040_v51  ;;  %v1563_v9 = vmul.f32 %v1435_v20, %v1051_v56  ;;  %v1438_v41 = vadd.f32 1.0, %v3087_v16  ;;  %v1432_v47 = vadd.f32 1.0, %v3083_v17 }
 0x218   : > { %v1554_v3 = vmul.f32 %v1426_v46, %v1042_v37  ;;  %v1633_v58 = vpack.c.bf16 %v1565_v28, %v1561_v29  ;;  %v1434_v42 = vadd.f32 1.0, %v3089_v21  ;;  %v1052_v15 = vmul.f32 0.5, %v4596_v6 }
 0x219   : > { %v3091_v35 = vpop.eup %3090  ;;  %v1628_v54 = vpack.c.bf16 %v1556_v45, %v1552_v50  ;;  %v1635_v23 = vpack.c.bf16 %v1567_v33, %v1563_v9  ;;  %v1054_v26 = vmul.f32 0.5, %v4611_v12  ;;  %v1048_v0 = vmul.f32 0.5, %v4586_v5 }
 0x21a   : > { %v1630_v57 = vpack.c.bf16 %v1558_v19, %v1554_v3  ;;  %v1441_v32 = vadd.f32 1.0, %v3091_v35  ;;  %v1050_v60 = vmul.f32 0.5, %v4615_v10  ;;  %v1564_v59 = vmul.f32 %v1436_v40, %v1052_v15 }
 0x21b   : > { %v3093_v39 = vpop.eup %3092  ;;  %2040 = vmatmul.mubr.bf16.gmra.mxu0 %v1628_v54  ;;  %v1566_v52 = vmul.f32 %v1438_v41, %v1054_v26  ;;  %v1057_v63 = vmul.f32 0.5, %v4640_v31  ;;  %v1061_v6 = vmul.f32 0.5, %v4665_v30  ;;  %v1560_v18 = vmul.f32 %v1432_v47, %v1048_v0 }
 0x21c   : > { %v3095_v14 = vpop.eup %3094  ;;  %2201 = vmatmul.mubr.bf16.gmra.mxu1 %v1630_v57  ;;  %2047 = vmatprep.mubr.bf16.mxu0 %v1633_v58  ;;  %v1443_v11 = vadd.f32 1.0, %v3093_v39  ;;  %v1562_v4 = vmul.f32 %v1434_v42, %v1050_v60  ;;  %v1059_v1 = vmul.f32 0.5, %v4644_v27  ;;  %v1063_v10 = vmul.f32 0.5, %v4668_v48 }
 0x21d   : > { %v3097_v13 = vpop.eup %3096  ;;  %2208 = vmatprep.mubr.bf16.mxu1 %v1635_v23  ;;  %v1569_v34 = vmul.f32 %v1441_v32, %v1057_v63  ;;  %v1632_v8 = vpack.c.bf16 %v1564_v59, %v1560_v18  ;;  %v1444_v20 = vadd.f32 1.0, %v3095_v14  ;;  %v1060_v46 = vmul.f32 0.5, %v4647_v44 }
 0x21e   : > { %v3099_v61 = vpop.eup %3098  ;;  %v1445_v12 = vadd.f32 1.0, %v3097_v13  ;;  %v1634_v55 = vpack.c.bf16 %v1566_v52, %v1562_v4  ;;  %v1571_v31 = vmul.f32 %v1443_v11, %v1059_v1  ;;  %v1062_v27 = vmul.f32 0.5, %v4658_v22  ;;  %v4708_v22 = vld [vmem:[%s4831_s4] ss:$0 sm:$0xff] }
 0x21f   : > { %v3101_v53 = vpop.eup %3100  ;;  %v1446_v62 = vadd.f32 1.0, %v3099_v61  ;;  %v1056_v48 = vmul.f32 0.5, %v4654_v7  ;;  %v1572_v24 = vmul.f32 %v1444_v20, %v1060_v46  ;;  %v1058_v51 = vmul.f32 0.5, %v4662_v43 }
 0x220   : > { %v3103_v2 = vpop.eup %3102  ;;  %v1573_v5 = vmul.f32 %v1445_v12, %v1061_v6  ;;  %v1447_v49 = vadd.f32 1.0, %v3101_v53 }
 0x221   : > { %v3105_v36 = vpop.eup %3104  ;;  %v1440_v17 = vadd.f32 1.0, %v3103_v2  ;;  %v1574_v45 = vmul.f32 %v1446_v62, %v1062_v27 }
 0x222   : > { %v1575_v25 = vmul.f32 %v1447_v49, %v1063_v10  ;;  %v1637_v30 = vpack.c.bf16 %v1573_v5, %v1569_v34  ;;  %v1442_v38 = vadd.f32 1.0, %v3105_v36 }
 0x223   : > { %2048 = vmatmul.mubr.bf16.gmra.mxu0 %v1632_v8  ;;  %v1568_v56 = vmul.f32 %v1440_v17, %v1056_v48 }
 0x224   : > { %2209 = vmatmul.mubr.bf16.gmra.mxu1 %v1634_v55  ;;  %2055 = vmatprep.mubr.bf16.mxu0 %v1637_v30  ;;  %v1639_v28 = vpack.c.bf16 %v1575_v25, %v1571_v31  ;;  %v1570_v33 = vmul.f32 %v1442_v38, %v1058_v51 }
 0x225   : > { %v1636_v16 = vpack.c.bf16 %v1572_v24, %v1568_v56 }
 0x226   : > { %2216 = vmatprep.mubr.bf16.mxu1 %v1639_v28  ;;  %v1638_v37 = vpack.c.bf16 %v1574_v45, %v1570_v33 }
 0x22b   : > { %2056 = vmatmul.mubr.bf16.gmra.mxu0 %v1636_v16 }
 0x22c   : > { %2217 = vmatmul.mubr.bf16.gmra.mxu1 %v1638_v37 }
 0x235   : > { %v2476_v44 = vpop.f32.mrf.mxu0 }
 0x237   : > { %v2588_v19 = vpop.f32.mrf.mxu1  ;;  %v2477_v7 = vpop.f32.mrf.mxu0 }
 0x238   : > { %v2478_v29 = vadd.f32 %v2477_v7, %v2476_v44 }
 0x239   : > { %v2589_v21 = vpop.f32.mrf.mxu1  ;;  %v2479_v43 = vpop.f32.mrf.mxu0 }
 0x23a   : > { %v1938_v50 = vadd.f32 %v2478_v29, %v4708_v22  ;;  %v2590_v9 = vadd.f32 %v2589_v21, %v2588_v19 }
 0x23b   : > { %v2591_v3 = vpop.f32.mrf.mxu1  ;;  %v2480_v58 = vpop.f32.mrf.mxu0 }
 0x23c   : > { %v2099_v35 = vadd.f32 %v2590_v9, %v1938_v50  ;;  %v2481_v54 = vadd.f32 %v2480_v58, %v2479_v43 }
 0x23d   : > { %v2592_v40 = vpop.f32.mrf.mxu1 }
 0x23e   : > { %2225 = vst [vmem:[%s4713_s15] sm:$0xff] %v2099_v35  ;;  %v1941_v41 = vadd.f32 %v2481_v54, %v4708_v22  ;;  %v2593_v23 = vadd.f32 %v2592_v40, %v2591_v3 }
 0x240   : > { %v2102_v57 = vadd.f32 %v2593_v23, %v1941_v41 }
 0x242   : > { %2226 = vst [vmem:[%s4713_s15 + $0x8] sm:$0xff] %v2102_v57 }
 0x245   : > { %v2482_v39 = vpop.f32.mrf.mxu0 }
 0x246   : > { %v2594_v47 = vpop.f32.mrf.mxu1 }
 0x247   : > { %v2483_v42 = vpop.f32.mrf.mxu0 }
 0x248   : > { %v2484_v15 = vadd.f32 %v2483_v42, %v2482_v39  ;;  %v2595_v26 = vpop.f32.mrf.mxu1 }
 0x249   : > { %v2485_v14 = vpop.f32.mrf.mxu0  ;;  %v2596_v13 = vadd.f32 %v2595_v26, %v2594_v47 }
 0x24a   : > { %v1946_v32 = vadd.f32 %v2484_v15, %v4708_v22  ;;  %v2597_v0 = vpop.f32.mrf.mxu1 }
 0x24b   : > { %v2486_v60 = vpop.f32.mrf.mxu0 }
 0x24c   : > { %v2107_v59 = vadd.f32 %v2596_v13, %v1946_v32  ;;  %v2487_v52 = vadd.f32 %v2486_v60, %v2485_v14  ;;  %v2598_v61 = vpop.f32.mrf.mxu1 }
 0x24d   : > { %v2599_v11 = vadd.f32 %v2598_v61, %v2597_v0 }
 0x24e   : > { %2227 = vst [vmem:[%s4713_s15 + $0x10] sm:$0xff] %v2107_v59  ;;  %v1949_v63 = vadd.f32 %v2487_v52, %v4708_v22 }
 0x250   : > { %v2110_v6 = vadd.f32 %v2599_v11, %v1949_v63 }
 0x251   : > { %v2488_v12 = vpop.f32.mrf.mxu0 }
 0x252   : > { %2228 = vst [vmem:[%s4713_s15 + $0x18] sm:$0xff] %v2110_v6  ;;  %v2600_v53 = vpop.f32.mrf.mxu1 }
 0x253   : > { %v2489_v18 = vpop.f32.mrf.mxu0 }
 0x254   : > { %v2490_v4 = vadd.f32 %v2489_v18, %v2488_v12  ;;  %v2601_v1 = vpop.f32.mrf.mxu1 }
 0x255   : > { %v2491_v2 = vpop.f32.mrf.mxu0  ;;  %v2602_v5 = vadd.f32 %v2601_v1, %v2600_v53 }
 0x256   : > { %v1954_v34 = vadd.f32 %v2490_v4, %v4708_v22  ;;  %v2603_v10 = vpop.f32.mrf.mxu1 }
 0x257   : > { %v2492_v49 = vpop.f32.mrf.mxu0 }
 0x258   : > { %v2115_v36 = vadd.f32 %v2602_v5, %v1954_v34  ;;  %v2493_v8 = vadd.f32 %v2492_v49, %v2491_v2  ;;  %v2604_v55 = vpop.f32.mrf.mxu1 }
 0x259   : > { %v2605_v31 = vadd.f32 %v2604_v55, %v2603_v10 }
 0x25a   : > { %2229 = vst [vmem:[%s4713_s15 + $0x20] sm:$0xff] %v2115_v36  ;;  %v1957_v20 = vadd.f32 %v2493_v8, %v4708_v22 }
 0x25c   : > { %v2118_v62 = vadd.f32 %v2605_v31, %v1957_v20 }
 0x25d   : > { %v2494_v25 = vpop.f32.mrf.mxu0 }
 0x25e   : > { %2230 = vst [vmem:[%s4713_s15 + $0x28] sm:$0xff] %v2118_v62 }
 0x25f   : > { %v2495_v30 = vpop.f32.mrf.mxu0 }
 0x260   : > { %v2606_v17 = vpop.f32.mrf.mxu1  ;;  %v2496_v46 = vadd.f32 %v2495_v30, %v2494_v25 }
 0x261   : > { %v2497_v38 = vpop.f32.mrf.mxu0 }
 0x262   : > { %v1962_v27 = vadd.f32 %v2496_v46, %v4708_v22  ;;  %v2607_v28 = vpop.f32.mrf.mxu1 }
 0x263   : > { %v2608_v48 = vadd.f32 %v2607_v28, %v2606_v17  ;;  %v2498_v24 = vpop.f32.mrf.mxu0 }
 0x264   : > { %v2609_v51 = vpop.f32.mrf.mxu1  ;;  %v2499_v45 = vadd.f32 %v2498_v24, %v2497_v38 }
 0x265   : > { %v2123_v56 = vadd.f32 %v2608_v48, %v1962_v27 }
 0x266   : > { %v1965_v33 = vadd.f32 %v2499_v45, %v4708_v22  ;;  %v2610_v16 = vpop.f32.mrf.mxu1 }
 0x267   : > { %2231 = vst [vmem:[%s4713_s15 + $0x30] sm:$0xff] %v2123_v56  ;;  %v2611_v37 = vadd.f32 %v2610_v16, %v2609_v51 }
 0x269   : > { %v2126_v44 = vadd.f32 %v2611_v37, %v1965_v33 }
 0x26b   : > { %2232 = vst [vmem:[%s4713_s15 + $0x38] sm:$0xff] %v2126_v44  ;;  %v2500_v19 = vpop.f32.mrf.mxu0  ;;  %v2612_v7 = vpop.f32.mrf.mxu1 }
 0x26d   : > { %v2501_v29 = vpop.f32.mrf.mxu0  ;;  %v2613_v21 = vpop.f32.mrf.mxu1 }
 0x26e   : > { %v2502_v43 = vadd.f32 %v2501_v29, %v2500_v19  ;;  %v2614_v58 = vadd.f32 %v2613_v21, %v2612_v7 }
 0x26f   : > { %v2503_v50 = vpop.f32.mrf.mxu0  ;;  %v2615_v9 = vpop.f32.mrf.mxu1 }
 0x270   : > { %v1970_v3 = vadd.f32 %v2502_v43, %v4708_v22 }
 0x271   : > { %v2504_v35 = vpop.f32.mrf.mxu0  ;;  %v2616_v54 = vpop.f32.mrf.mxu1 }
 0x272   : > { %v2131_v40 = vadd.f32 %v2614_v58, %v1970_v3  ;;  %v2505_v41 = vadd.f32 %v2504_v35, %v2503_v50  ;;  %v2617_v57 = vadd.f32 %v2616_v54, %v2615_v9 }
 0x274   : > { %2233 = vst [vmem:[%s4713_s15 + $0x40] sm:$0xff] %v2131_v40  ;;  %v1973_v23 = vadd.f32 %v2505_v41, %v4708_v22 }
 0x276   : > { %v2134_v39 = vadd.f32 %v2617_v57, %v1973_v23 }
 0x278   : > { %2234 = vst [vmem:[%s4713_s15 + $0x48] sm:$0xff] %v2134_v39  ;;  %v2506_v47 = vpop.f32.mrf.mxu0 }
 0x279   : > { %v2618_v42 = vpop.f32.mrf.mxu1 }
 0x27a   : > { %v2507_v15 = vpop.f32.mrf.mxu0 }
 0x27b   : > { %v2508_v26 = vadd.f32 %v2507_v15, %v2506_v47  ;;  %v2619_v14 = vpop.f32.mrf.mxu1 }
 0x27c   : > { %v2509_v32 = vpop.f32.mrf.mxu0  ;;  %v2620_v0 = vadd.f32 %v2619_v14, %v2618_v42 }
 0x27d   : > { %v1978_v13 = vadd.f32 %v2508_v26, %v4708_v22  ;;  %v2621_v60 = vpop.f32.mrf.mxu1 }
 0x27e   : > { %v2510_v59 = vpop.f32.mrf.mxu0 }
 0x27f   : > { %v2139_v52 = vadd.f32 %v2620_v0, %v1978_v13  ;;  %v2511_v61 = vadd.f32 %v2510_v59, %v2509_v32  ;;  %v2622_v63 = vpop.f32.mrf.mxu1 }
 0x280   : > { %v2623_v6 = vadd.f32 %v2622_v63, %v2621_v60 }
 0x281   : > { %2235 = vst [vmem:[%s4713_s15 + $0x50] sm:$0xff] %v2139_v52  ;;  %v1981_v11 = vadd.f32 %v2511_v61, %v4708_v22 }
 0x283   : > { %v2142_v12 = vadd.f32 %v2623_v6, %v1981_v11 }
 0x285   : > { %2236 = vst [vmem:[%s4713_s15 + $0x58] sm:$0xff] %v2142_v12  ;;  %v2512_v53 = vpop.f32.mrf.mxu0  ;;  %v2624_v18 = vpop.f32.mrf.mxu1 }
 0x287   : > { %v2513_v4 = vpop.f32.mrf.mxu0  ;;  %v2625_v1 = vpop.f32.mrf.mxu1 }
 0x288   : > { %v2514_v2 = vadd.f32 %v2513_v4, %v2512_v53  ;;  %v2626_v49 = vadd.f32 %v2625_v1, %v2624_v18 }
 0x289   : > { %v2515_v34 = vpop.f32.mrf.mxu0  ;;  %v2627_v5 = vpop.f32.mrf.mxu1 }
 0x28a   : > { %v1986_v10 = vadd.f32 %v2514_v2, %v4708_v22 }
 0x28b   : > { %v2516_v36 = vpop.f32.mrf.mxu0  ;;  %v2628_v8 = vpop.f32.mrf.mxu1 }
 0x28c   : > { %v2147_v55 = vadd.f32 %v2626_v49, %v1986_v10  ;;  %v2517_v20 = vadd.f32 %v2516_v36, %v2515_v34  ;;  %v2629_v62 = vadd.f32 %v2628_v8, %v2627_v5 }
 0x28e   : > { %2237 = vst [vmem:[%s4713_s15 + $0x60] sm:$0xff] %v2147_v55  ;;  %v1989_v31 = vadd.f32 %v2517_v20, %v4708_v22 }
 0x290   : > { %v2150_v25 = vadd.f32 %v2629_v62, %v1989_v31 }
 0x292   : > { %2238 = vst [vmem:[%s4713_s15 + $0x68] sm:$0xff] %v2150_v25  ;;  %v2518_v30 = vpop.f32.mrf.mxu0  ;;  %v2630_v17 = vpop.f32.mrf.mxu1 }
 0x294   : > { %v2519_v46 = vpop.f32.mrf.mxu0  ;;  %v2631_v38 = vpop.f32.mrf.mxu1 }
 0x295   : > { %v2520_v27 = vadd.f32 %v2519_v46, %v2518_v30  ;;  %v2632_v51 = vadd.f32 %v2631_v38, %v2630_v17 }
 0x296   : > { %v2521_v28 = vpop.f32.mrf.mxu0  ;;  %v2633_v48 = vpop.f32.mrf.mxu1 }
 0x297   : > { %v1994_v24 = vadd.f32 %v2520_v27, %v4708_v22 }
 0x298   : > { %v2522_v45 = vpop.f32.mrf.mxu0  ;;  %v2634_v56 = vpop.f32.mrf.mxu1 }
 0x299   : > { %v2155_v33 = vadd.f32 %v2632_v51, %v1994_v24  ;;  %v2523_v16 = vadd.f32 %v2522_v45, %v2521_v28  ;;  %v2635_v44 = vadd.f32 %v2634_v56, %v2633_v48 }
 0x29b   : > { %2239 = vst [vmem:[%s4713_s15 + $0x70] sm:$0xff] %v2155_v33  ;;  %v1997_v37 = vadd.f32 %v2523_v16, %v4708_v22 }
 0x29d   : > { %v2158_v19 = vadd.f32 %v2635_v44, %v1997_v37 }
 0x29f   : > { %2240 = vst [vmem:[%s4713_s15 + $0x78] sm:$0xff] %v2158_v19  ;;  %v2524_v7 = vpop.f32.mrf.mxu0  ;;  %v2636_v29 = vpop.f32.mrf.mxu1 }
 0x2a1   : > { %v2525_v21 = vpop.f32.mrf.mxu0  ;;  %v2637_v43 = vpop.f32.mrf.mxu1 }
 0x2a2   : > { %v2526_v50 = vadd.f32 %v2525_v21, %v2524_v7  ;;  %v2638_v35 = vadd.f32 %v2637_v43, %v2636_v29 }
 0x2a3   : > { %v2527_v9 = vpop.f32.mrf.mxu0  ;;  %v2639_v3 = vpop.f32.mrf.mxu1 }
 0x2a4   : > { %v2002_v58 = vadd.f32 %v2526_v50, %v4708_v22 }
 0x2a5   : > { %v2528_v54 = vpop.f32.mrf.mxu0  ;;  %v2640_v40 = vpop.f32.mrf.mxu1 }
 0x2a6   : > { %v2163_v41 = vadd.f32 %v2638_v35, %v2002_v58  ;;  %v2529_v23 = vadd.f32 %v2528_v54, %v2527_v9  ;;  %v2641_v39 = vadd.f32 %v2640_v40, %v2639_v3 }
 0x2a8   : > { %2241 = vst [vmem:[%s4713_s15 + $0x80] sm:$0xff] %v2163_v41  ;;  %v2005_v57 = vadd.f32 %v2529_v23, %v4708_v22 }
 0x2aa   : > { %v2166_v47 = vadd.f32 %v2641_v39, %v2005_v57 }
 0x2ac   : > { %2242 = vst [vmem:[%s4713_s15 + $0x88] sm:$0xff] %v2166_v47  ;;  %v2530_v42 = vpop.f32.mrf.mxu0  ;;  %v2642_v15 = vpop.f32.mrf.mxu1 }
 0x2ae   : > { %v2531_v26 = vpop.f32.mrf.mxu0  ;;  %v2643_v14 = vpop.f32.mrf.mxu1 }
 0x2af   : > { %v2532_v32 = vadd.f32 %v2531_v26, %v2530_v42  ;;  %v2644_v59 = vadd.f32 %v2643_v14, %v2642_v15 }
 0x2b0   : > { %v2533_v13 = vpop.f32.mrf.mxu0  ;;  %v2645_v0 = vpop.f32.mrf.mxu1 }
 0x2b1   : > { %v2010_v60 = vadd.f32 %v2532_v32, %v4708_v22 }
 0x2b2   : > { %v2534_v52 = vpop.f32.mrf.mxu0  ;;  %v2646_v61 = vpop.f32.mrf.mxu1 }
 0x2b3   : > { %v2171_v63 = vadd.f32 %v2644_v59, %v2010_v60  ;;  %v2535_v11 = vadd.f32 %v2534_v52, %v2533_v13  ;;  %v2647_v12 = vadd.f32 %v2646_v61, %v2645_v0 }
 0x2b5   : > { %2243 = vst [vmem:[%s4713_s15 + $0x90] sm:$0xff] %v2171_v63  ;;  %v2013_v6 = vadd.f32 %v2535_v11, %v4708_v22 }
 0x2b7   : > { %v2174_v53 = vadd.f32 %v2647_v12, %v2013_v6 }
 0x2b9   : > { %2244 = vst [vmem:[%s4713_s15 + $0x98] sm:$0xff] %v2174_v53  ;;  %v2536_v18 = vpop.f32.mrf.mxu0 }
 0x2bb   : > { %v2648_v4 = vpop.f32.mrf.mxu1  ;;  %v2537_v1 = vpop.f32.mrf.mxu0 }
 0x2bc   : > { %v2538_v2 = vadd.f32 %v2537_v1, %v2536_v18 }
 0x2bd   : > { %v2649_v34 = vpop.f32.mrf.mxu1  ;;  %v2539_v5 = vpop.f32.mrf.mxu0 }
 0x2be   : > { %v2018_v10 = vadd.f32 %v2538_v2, %v4708_v22  ;;  %v2650_v49 = vadd.f32 %v2649_v34, %v2648_v4 }
 0x2bf   : > { %v2651_v36 = vpop.f32.mrf.mxu1  ;;  %v2540_v8 = vpop.f32.mrf.mxu0 }
 0x2c0   : > { %v2179_v55 = vadd.f32 %v2650_v49, %v2018_v10  ;;  %v2541_v20 = vadd.f32 %v2540_v8, %v2539_v5 }
 0x2c1   : > { %v2652_v31 = vpop.f32.mrf.mxu1 }
 0x2c2   : > { %2245 = vst [vmem:[%s4713_s15 + $0xa0] sm:$0xff] %v2179_v55  ;;  %v2021_v62 = vadd.f32 %v2541_v20, %v4708_v22  ;;  %v2653_v25 = vadd.f32 %v2652_v31, %v2651_v36 }
 0x2c4   : > { %v2182_v30 = vadd.f32 %v2653_v25, %v2021_v62 }
 0x2c6   : > { %2246 = vst [vmem:[%s4713_s15 + $0xa8] sm:$0xff] %v2182_v30 }
 0x2c9   : > { %v2542_v17 = vpop.f32.mrf.mxu0  ;;  %v2654_v46 = vpop.f32.mrf.mxu1 }
 0x2cb   : > { %v2543_v38 = vpop.f32.mrf.mxu0  ;;  %v2655_v27 = vpop.f32.mrf.mxu1 }
 0x2cc   : > { %v2544_v28 = vadd.f32 %v2543_v38, %v2542_v17  ;;  %v2656_v45 = vadd.f32 %v2655_v27, %v2654_v46 }
 0x2cd   : > { %v2545_v48 = vpop.f32.mrf.mxu0  ;;  %v2657_v24 = vpop.f32.mrf.mxu1 }
 0x2ce   : > { %v2026_v51 = vadd.f32 %v2544_v28, %v4708_v22 }
 0x2cf   : > { %v2546_v56 = vpop.f32.mrf.mxu0  ;;  %v2658_v33 = vpop.f32.mrf.mxu1 }
 0x2d0   : > { %v2187_v16 = vadd.f32 %v2656_v45, %v2026_v51  ;;  %v2547_v37 = vadd.f32 %v2546_v56, %v2545_v48  ;;  %v2659_v19 = vadd.f32 %v2658_v33, %v2657_v24 }
 0x2d2   : > { %2247 = vst [vmem:[%s4713_s15 + $0xb0] sm:$0xff] %v2187_v16  ;;  %v2029_v44 = vadd.f32 %v2547_v37, %v4708_v22 }
 0x2d3   : > { %v2548_v7 = vpop.f32.mrf.mxu0 }
 0x2d4   : > { %v2190_v29 = vadd.f32 %v2659_v19, %v2029_v44  ;;  %v2660_v21 = vpop.f32.mrf.mxu1 }
 0x2d5   : > { %v2549_v43 = vpop.f32.mrf.mxu0 }
 0x2d6   : > { %2248 = vst [vmem:[%s4713_s15 + $0xb8] sm:$0xff] %v2190_v29  ;;  %v2550_v50 = vadd.f32 %v2549_v43, %v2548_v7  ;;  %v2661_v9 = vpop.f32.mrf.mxu1 }
 0x2d7   : > { %v2551_v3 = vpop.f32.mrf.mxu0  ;;  %v2662_v35 = vadd.f32 %v2661_v9, %v2660_v21 }
 0x2d8   : > { %v2034_v58 = vadd.f32 %v2550_v50, %v4708_v22  ;;  %v2663_v54 = vpop.f32.mrf.mxu1 }
 0x2d9   : > { %v2552_v40 = vpop.f32.mrf.mxu0 }
 0x2da   : > { %v2195_v41 = vadd.f32 %v2662_v35, %v2034_v58  ;;  %v2553_v23 = vadd.f32 %v2552_v40, %v2551_v3  ;;  %v2664_v57 = vpop.f32.mrf.mxu1 }
 0x2db   : > { %v2554_v39 = vpop.f32.mrf.mxu0  ;;  %v2665_v42 = vadd.f32 %v2664_v57, %v2663_v54 }
 0x2dc   : > { %2249 = vst [vmem:[%s4713_s15 + $0xc0] sm:$0xff] %v2195_v41  ;;  %v2037_v47 = vadd.f32 %v2553_v23, %v4708_v22  ;;  %v2666_v15 = vpop.f32.mrf.mxu1 }
 0x2dd   : > { %v2555_v26 = vpop.f32.mrf.mxu0 }
 0x2de   : > { %v2198_v14 = vadd.f32 %v2665_v42, %v2037_v47  ;;  %v2556_v32 = vadd.f32 %v2555_v26, %v2554_v39  ;;  %v2667_v13 = vpop.f32.mrf.mxu1 }
 0x2df   : > { %v2557_v0 = vpop.f32.mrf.mxu0  ;;  %v2668_v59 = vadd.f32 %v2667_v13, %v2666_v15 }
 0x2e0   : > { %2250 = vst [vmem:[%s4713_s15 + $0xc8] sm:$0xff] %v2198_v14  ;;  %v2042_v60 = vadd.f32 %v2556_v32, %v4708_v22  ;;  %v2669_v52 = vpop.f32.mrf.mxu1 }
 0x2e1   : > { %v2558_v61 = vpop.f32.mrf.mxu0 }
 0x2e2   : > { %v2203_v63 = vadd.f32 %v2668_v59, %v2042_v60  ;;  %v2559_v11 = vadd.f32 %v2558_v61, %v2557_v0  ;;  %v2670_v6 = vpop.f32.mrf.mxu1 }
 0x2e3   : > { %v2560_v12 = vpop.f32.mrf.mxu0  ;;  %v2671_v18 = vadd.f32 %v2670_v6, %v2669_v52 }
 0x2e4   : > { %2251 = vst [vmem:[%s4713_s15 + $0xd0] sm:$0xff] %v2203_v63  ;;  %v2045_v53 = vadd.f32 %v2559_v11, %v4708_v22  ;;  %v2672_v4 = vpop.f32.mrf.mxu1 }
 0x2e5   : > { %v2561_v1 = vpop.f32.mrf.mxu0 }
 0x2e6   : > { %v2206_v2 = vadd.f32 %v2671_v18, %v2045_v53  ;;  %v2562_v34 = vadd.f32 %v2561_v1, %v2560_v12  ;;  %v2673_v5 = vpop.f32.mrf.mxu1 }
 0x2e7   : > { %v2563_v10 = vpop.f32.mrf.mxu0  ;;  %v2674_v36 = vadd.f32 %v2673_v5, %v2672_v4 }
 0x2e8   : > { %2252 = vst [vmem:[%s4713_s15 + $0xd8] sm:$0xff] %v2206_v2  ;;  %v2050_v49 = vadd.f32 %v2562_v34, %v4708_v22  ;;  %v2675_v8 = vpop.f32.mrf.mxu1 }
 0x2e9   : > { %v2564_v55 = vpop.f32.mrf.mxu0 }
 0x2ea   : > { %v2211_v20 = vadd.f32 %v2674_v36, %v2050_v49  ;;  %v2565_v31 = vadd.f32 %v2564_v55, %v2563_v10  ;;  %v2676_v62 = vpop.f32.mrf.mxu1 }
 0x2eb   : > { %v2566_v25 = vpop.f32.mrf.mxu0  ;;  %v2677_v17 = vadd.f32 %v2676_v62, %v2675_v8 }
 0x2ec   : > { %2253 = vst [vmem:[%s4713_s15 + $0xe0] sm:$0xff] %v2211_v20  ;;  %v2053_v30 = vadd.f32 %v2565_v31, %v4708_v22  ;;  %v2678_v46 = vpop.f32.mrf.mxu1 }
 0x2ed   : > { %v2567_v38 = vpop.f32.mrf.mxu0 }
 0x2ee   : > { %v2214_v27 = vadd.f32 %v2677_v17, %v2053_v30  ;;  %v2568_v28 = vadd.f32 %v2567_v38, %v2566_v25  ;;  %v2679_v48 = vpop.f32.mrf.mxu1 }
 0x2ef   : > { %v2569_v24 = vpop.f32.mrf.mxu0  ;;  %v2680_v45 = vadd.f32 %v2679_v48, %v2678_v46 }
 0x2f0   : > { %2254 = vst [vmem:[%s4713_s15 + $0xe8] sm:$0xff] %v2214_v27  ;;  %v2058_v51 = vadd.f32 %v2568_v28, %v4708_v22  ;;  %v2681_v56 = vpop.f32.mrf.mxu1 }
 0x2f1   : > { %v2570_v33 = vpop.f32.mrf.mxu0 }
 0x2f2   : > { %v2219_v16 = vadd.f32 %v2680_v45, %v2058_v51  ;;  %v2571_v37 = vadd.f32 %v2570_v33, %v2569_v24  ;;  %v2682_v44 = vpop.f32.mrf.mxu1 }
 0x2f3   : > { %v2683_v7 = vadd.f32 %v2682_v44, %v2681_v56 }
 0x2f4   : > { %2255 = vst [vmem:[%s4713_s15 + $0xf0] sm:$0xff] %v2219_v16  ;;  %v2061_v19 = vadd.f32 %v2571_v37, %v4708_v22 }
 0x2f6   : > { %v2222_v29 = vadd.f32 %v2683_v7, %v2061_v19 }
 0x2f8   : > { %2256 = vst [vmem:[%s4713_s15 + $0xf8] sm:$0xff] %v2222_v29 }
 0x2f9   : > { %3225 = shalt.err (!%p3222_p9)
}
 0x2fa   : > { %s3226_s9 = scalar_lea.hbm %s4782_s13, 4096  ;;  %s3230_s24 = scalar_lea.hbm %s4832_s5, 16384 }
 0x2fb   : > { %p3227_p1 = scmp.ne.s32.totalorder %s4782_s13, %s3226_s9  ;;  %p3231_p10 = scmp.lt.s32.totalorder %s4782_s13, %s4832_s5 }
 0x2fc   : > { %p3232_p12 = scmp.lt.s32.totalorder %s3230_s24, %s3226_s9 }
 0x2fd   : > { %p3228_p8 = pnand %p3227_p1, %p4872_p6 }
 0x2fe   : > { %p3233_p2 = por %p3232_p12, %p3231_p10 }
 0x2ff   : > { %p3229_p5 = pneg %p3228_p8 }
 0x301   : > { %p3234_p4 = pnand %p3233_p2, %p3229_p5 }
 0x303   : > { %3237 = shalt.err (!%p3234_p4)
}
 0x304   : > { %s3298_s17 = smov 128   ;;  %s3299_s27 = smov 8  }
 0x305   : > { %2698 = dma.vmem_to_hbm [thread:$0]  (%p4872_p6), %s4784_s23, 4096, %s4782_s13, %s2258_s14, %s3298_s17, %s3298_s17, %s3299_s27  }
 0x306 PF: > { %p2725_p11 = scmp.ge.s32.totalorder %s3284_s21, 2  ;;  %s2286_s29 = sand.u32 1, %s3272_s18  }
 0x307   : > { %p4873_p13 = scmp.ne.s32.totalorder %s4838_s25, 0  ;;  %s2287_s16 = scalar_lea.sflag [#allocation4], %s2286_s29 }
 0x309   : > { %p2715_p3 = pnand %p2725_p11, %p4873_p13 }
 0x30b   : > { %p2716_p0 = pneg %p2715_p3 }
 0x30d   : > { %3267 = dma.done.wait (%p2716_p0), %s2287_s16, 4096  }
 0x30e   : > { %3269 = vsyncadd (%p2716_p0), %s2287_s16, 4294963200  ;;  %p20_p7 = scmp.ge.s32.totalorder %s3409_s6, 6   ;;  %s4874_s18 = smov %s3276_s19 }
 0x30f   : > { %s4875_s19 = smov %s3280_s20  ;;  %s4876_s20 = smov %s3419_s10 }
 0x310   : > { %s4877_s21 = smov %s3409_s6  ;;  %22 = sbr.rel (!%p20_p7) target bundleno = 7 (0x7), region = 97 }
 0x315   :  { %2292 = vsyncpa [#allocation3], 1 }
 0x316   :  { %2294 = vsyncpa [#allocation3 + $0x1], 1 }
 0x317   :  { %2295 = vsyncpa [#allocation6], 1 }
 0x318   :  { %2296 = vsyncpa [#allocation9], 1 }
 0x319   :  { %2297 = vsyncpa [#allocation4], 1 }
 0x31a   :  { %2299 = vsyncpa [#allocation4 + $0x1], 1 }

</bundles_post_ra>
